<compile_context>
chip_gen: v7x
topology: tpu7x:2x2x1
jax: 0.10.0
libtpu: 0.0.40
codegen_flags: <defaults>
</compile_context>

<pallas_src>
import math

import jax
import jax.numpy as jnp
import numpy as np
from jax.experimental import pallas as pl
from jax.experimental.pallas import tpu as pltpu  # noqa: F401  (TPU-specific tuning hooks)


# ----------------------------------------------------------------------------
# Fused kernel: all LSTM layers + last-timestep Linear in one invocation.
# ----------------------------------------------------------------------------
def _make_char_model_kernel(num_layers, seq, batch, hidden):
    H = hidden

    def kernel(x_ref, *rest):
        # rest layout: per layer l: (wih_t, bias, whh_t); then wlin_t, blin, out_ref
        layer_refs = rest[:3 * num_layers]
        wlin_ref, blin_ref, out_ref = rest[3 * num_layers:]

        zeros = jnp.zeros((batch, H), jnp.float32)

        xin = x_ref[...]                         # (seq*batch, in_dim)  bf16
        h = zeros
        for l in range(num_layers):
            wih = layer_refs[3 * l][...]         # (in_dim, 4H) bf16, i/f/o cols pre-scaled 0.5
            b = layer_refs[3 * l + 1][...]       # (1, 4H)      f32,  i/f/o pre-scaled 0.5
            whh = layer_refs[3 * l + 2][...]     # (H, 4H)      bf16, i/f/o cols pre-scaled 0.5

            # ONE stacked input projection per layer (M = seq*batch rows), bias added
            # once.  Entirely off the serial h-recurrence.
            xg_all = jnp.dot(xin, wih, preferred_element_type=jnp.float32) + b

            h, c = zeros, zeros
            hs = []
            for t in range(seq):
                # Serial chain per step: one (batch, H) x (H, 4H) matmul + elementwise.
                # whh is loop-invariant across this statically unrolled loop.
                g = xg_all[t * batch:(t + 1) * batch, :] + jnp.dot(
                    h.astype(jnp.bfloat16), whh, preferred_element_type=jnp.float32)
                # One full-width EUP tanh over all 4H lanes; sigmoid gates recovered
                # on the VPU (sigmoid(x) = 0.5*(1+tanh(x/2)); the /2 was folded into
                # the wrapper-side 0.5 pre-scale of the i/f/o weight columns).
                tg = jnp.tanh(g)
                i_g = 0.5 * (1.0 + tg[:, 0 * H:1 * H])
                f_g = 0.5 * (1.0 + tg[:, 1 * H:2 * H])
                g_g = tg[:, 2 * H:3 * H]
                o_g = 0.5 * (1.0 + tg[:, 3 * H:4 * H])
                c = f_g * c + i_g * g_g
                h = o_g * jnp.tanh(c)
                hs.append(h)

            if l + 1 < num_layers:
                # inter-layer LSTM dropout: identity in eval mode
                xin = jnp.concatenate(hs, axis=0).astype(jnp.bfloat16)

        # last timestep -> (nn.Dropout identity in eval) -> Linear
        out_ref[...] = (jnp.dot(h.astype(jnp.bfloat16), wlin_ref[...],
                                preferred_element_type=jnp.float32) + blin_ref[...])

    return kernel


# ----------------------------------------------------------------------------
# CharModel forward (eval mode) — single jit, single pallas_call.
# ----------------------------------------------------------------------------
@jax.jit
def char_model_forward(x, params):
    """x: (batch, seq, input_size)  ->  (batch, output_size)."""
    lstm = params["lstm"]
    num_layers = len(lstm)
    H = lstm[0][1].shape[1]
    out_dim = params["linear_w"].shape[0]
    batch, seq, in_dim = x.shape

    # Lane-alignment of the 4H gate tile and the H/2H/3H gate slices.
    assert (4 * H) % 128 == 0, "4*hidden_size must be a multiple of 128 (pad hidden_size)"

    # Pad batch up to the f32 sublane tile (8): identical recurrence latency,
    # 4x sublane / MXU-row occupancy.
    B = ((batch + 7) // 8) * 8
    if B != batch:
        x = jnp.pad(x, ((0, B - batch), (0, 0), (0, 0)))

    # Time-major, stacked over (seq*B) rows; bf16 MXU operands (accumulation stays f32).
    x_flat = jnp.transpose(x, (1, 0, 2)).reshape(seq * B, in_dim).astype(jnp.bfloat16)

    # Pre-scale sigmoid-gate (i, f, o) columns by 0.5 -> single-tanh gate evaluation.
    gate_scale = jnp.concatenate([jnp.full((H,), 0.5, jnp.float32),
                                  jnp.full((H,), 0.5, jnp.float32),
                                  jnp.ones((H,), jnp.float32),
                                  jnp.full((H,), 0.5, jnp.float32)])

    inputs = [x_flat]
    for (w_ih, w_hh, b_ih, b_hh) in lstm:
        inputs += [
            (w_ih.T.astype(jnp.float32) * gate_scale[None, :]).astype(jnp.bfloat16),  # (in, 4H)
            ((b_ih + b_hh).astype(jnp.float32) * gate_scale)[None, :],                # (1, 4H) f32
            (w_hh.T.astype(jnp.float32) * gate_scale[None, :]).astype(jnp.bfloat16),  # (H, 4H)
        ]
    inputs += [
        params["linear_w"].T.astype(jnp.bfloat16),                                    # (H, out)
        params["linear_b"][None, :].astype(jnp.float32),                              # (1, out)
    ]

    kernel = _make_char_model_kernel(num_layers, seq, B, H)
    out = pl.pallas_call(
        kernel,
        out_shape=jax.ShapeDtypeStruct((B, out_dim), jnp.float32),
        # Grid-less: single invocation, all operands whole-array resident in VMEM
        # (< 100 KiB total at these shapes — far under default scoped VMEM limits).
    )(*inputs)
    return out[:batch]


# ----------------------------------------------------------------------------
# Deterministic parameter construction (PyTorch-style U(-1/sqrt(H), 1/sqrt(H)))
# ----------------------------------------------------------------------------
def init_params(key, input_size, hidden_size, num_layers, output_size):
    bound = 1.0 / math.sqrt(hidden_size)
    params = {"lstm": []}
    for layer in range(num_layers):
        in_dim = input_size if layer == 0 else hidden_size
        key, k1, k2, k3, k4 = jax.random.split(key, 5)
        w_ih = jax.random.uniform(k1, (4 * hidden_size, in_dim),
                                  jnp.float32, -bound, bound)
        w_hh = jax.random.uniform(k2, (4 * hidden_size, hidden_size),
                                  jnp.float32, -bound, bound)
        b_ih = jax.random.uniform(k3, (4 * hidden_size,),
                                  jnp.float32, -bound, bound)
        b_hh = jax.random.uniform(k4, (4 * hidden_size,),
                                  jnp.float32, -bound, bound)
        params["lstm"].append((w_ih, w_hh, b_ih, b_hh))
    key, k1, k2 = jax.random.split(key, 3)
    lin_bound = 1.0 / math.sqrt(hidden_size)
    params["linear_w"] = jax.random.uniform(
        k1, (output_size, hidden_size), jnp.float32, -lin_bound, lin_bound)
    params["linear_b"] = jax.random.uniform(
        k2, (output_size,), jnp.float32, -lin_bound, lin_bound)
    return params


# ----------------------------------------------------------------------------
# Pure-JAX f32 reference for correctness checking
# ----------------------------------------------------------------------------
def reference_forward(x, params):
    h_seq = jnp.transpose(x, (1, 0, 2))  # (seq, batch, feat)
    for (w_ih, w_hh, b_ih, b_hh) in params["lstm"]:
        H = w_hh.shape[1]
        batch = h_seq.shape[1]

        def step(carry, x_t):
            h, c = carry
            gates = x_t @ w_ih.T + h @ w_hh.T + b_ih + b_hh
            i_g = jax.nn.sigmoid(gates[:, 0 * H:1 * H])
            f_g = jax.nn.sigmoid(gates[:, 1 * H:2 * H])
            g_g = jnp.tanh(gates[:, 2 * H:3 * H])
            o_g = jax.nn.sigmoid(gates[:, 3 * H:4 * H])
            c_new = f_g * c + i_g * g_g
            h_new = o_g * jnp.tanh(c_new)
            return (h_new, c_new), h_new

        init = (jnp.zeros((batch, H), jnp.float32),
                jnp.zeros((batch, H), jnp.float32))
        _, h_seq = jax.lax.scan(step, init, h_seq)
    last_h = h_seq[-1]
    return last_h @ params["linear_w"].T + params["linear_b"]


if __name__ == "__main__":
    # Small shapes consistent with the module's forward.
    batch, seq = 2, 8
    input_size, hidden_size, num_layers, output_size = 16, 32, 2, 16
    dropout_rate = 0.2  # unused in eval mode

    key = jax.random.PRNGKey(0)
    key, xk = jax.random.split(key)
    x = jax.random.normal(xk, (batch, seq, input_size), jnp.float32)

    params = init_params(key, input_size, hidden_size, num_layers, output_size)

    out = jax.block_until_ready(char_model_forward(x, params))
    ref = jax.block_until_ready(reference_forward(x, params))

    assert out.shape == (batch, output_size)
    # Kernel uses bf16 MXU operands (native TPU path, f32 accumulation); the f32
    # reference therefore matches to bf16-level tolerance over the 16-step recurrence.
    np.testing.assert_allclose(np.asarray(out), np.asarray(ref),
                               rtol=2e-2, atol=2e-2)
    print("KERNEL_OK")
</pallas_src>

<mosaic_0001>
module attributes {stable_mosaic.version = 11 : i64} {
  func.func @kernel(%arg0: memref<64x16xbf16, #tpu.memory_space<vmem>>, %arg1: memref<16x128xbf16, #tpu.memory_space<vmem>>, %arg2: memref<1x128xf32, #tpu.memory_space<vmem>>, %arg3: memref<32x128xbf16, #tpu.memory_space<vmem>>, %arg4: memref<32x128xbf16, #tpu.memory_space<vmem>>, %arg5: memref<1x128xf32, #tpu.memory_space<vmem>>, %arg6: memref<32x128xbf16, #tpu.memory_space<vmem>>, %arg7: memref<32x16xbf16, #tpu.memory_space<vmem>>, %arg8: memref<1x16xf32, #tpu.memory_space<vmem>>, %arg9: memref<8x16xf32, #tpu.memory_space<vmem>>) attributes {dimension_semantics = [], scalar_prefetch = 0 : i64, scratch_operands = 0 : i64, tpu.core_type = #tpu.core_type<tc>} {
    %cst = arith.constant 0.000000e+00 : f32
    %0 = vector.broadcast %cst : f32 to vector<8x32xf32>
    %c0 = arith.constant 0 : index
    %c0_0 = arith.constant 0 : index
    %1 = vector.load %arg0[%c0, %c0_0] : memref<64x16xbf16, #tpu.memory_space<vmem>>, vector<64x16xbf16>
    %c0_1 = arith.constant 0 : index
    %c0_2 = arith.constant 0 : index
    %2 = vector.load %arg1[%c0_1, %c0_2] : memref<16x128xbf16, #tpu.memory_space<vmem>>, vector<16x128xbf16>
    %c0_3 = arith.constant 0 : index
    %c0_4 = arith.constant 0 : index
    %3 = vector.load %arg2[%c0_3, %c0_4] : memref<1x128xf32, #tpu.memory_space<vmem>>, vector<1x128xf32>
    %c0_5 = arith.constant 0 : index
    %c0_6 = arith.constant 0 : index
    %4 = vector.load %arg3[%c0_5, %c0_6] : memref<32x128xbf16, #tpu.memory_space<vmem>>, vector<32x128xbf16>
    %cst_7 = arith.constant dense<0.000000e+00> : vector<64x128xf32>
    %5 = tpu.matmul %1, %2, %cst_7 {dimension_numbers = #tpu.dot_dimension_numbers<[1], [0], [0], [1], [0, 0, 1, 1], [], []>} : vector<64x16xbf16>, vector<16x128xbf16>, vector<64x128xf32> -> vector<64x128xf32>
    %6 = vector.broadcast %3 : vector<1x128xf32> to vector<64x128xf32>
    %7 = arith.addf %5, %6 : vector<64x128xf32>
    %8 = vector.extract_strided_slice %7 {offsets = [0, 0], sizes = [8, 128], strides = [1, 1]} : vector<64x128xf32> to vector<8x128xf32>
    %9 = arith.truncf %0 : vector<8x32xf32> to vector<8x32xbf16>
    %cst_8 = arith.constant dense<0.000000e+00> : vector<8x128xf32>
    %10 = tpu.matmul %9, %4, %cst_8 {dimension_numbers = #tpu.dot_dimension_numbers<[1], [0], [0], [1], [0, 0, 1, 1], [], []>} : vector<8x32xbf16>, vector<32x128xbf16>, vector<8x128xf32> -> vector<8x128xf32>
    %11 = arith.addf %8, %10 : vector<8x128xf32>
    %12 = math.tanh %11 : vector<8x128xf32>
    %13 = vector.extract_strided_slice %12 {offsets = [0, 0], sizes = [8, 32], strides = [1, 1]} : vector<8x128xf32> to vector<8x32xf32>
    %cst_9 = arith.constant 1.000000e+00 : f32
    %14 = vector.broadcast %cst_9 : f32 to vector<8x32xf32>
    %15 = arith.addf %14, %13 : vector<8x32xf32>
    %cst_10 = arith.constant 5.000000e-01 : f32
    %16 = vector.broadcast %cst_10 : f32 to vector<8x32xf32>
    %17 = arith.mulf %16, %15 : vector<8x32xf32>
    %18 = vector.extract_strided_slice %12 {offsets = [0, 32], sizes = [8, 32], strides = [1, 1]} : vector<8x128xf32> to vector<8x32xf32>
    %cst_11 = arith.constant 1.000000e+00 : f32
    %19 = vector.broadcast %cst_11 : f32 to vector<8x32xf32>
    %20 = arith.addf %19, %18 : vector<8x32xf32>
    %cst_12 = arith.constant 5.000000e-01 : f32
    %21 = vector.broadcast %cst_12 : f32 to vector<8x32xf32>
    %22 = arith.mulf %21, %20 : vector<8x32xf32>
    %23 = vector.extract_strided_slice %12 {offsets = [0, 64], sizes = [8, 32], strides = [1, 1]} : vector<8x128xf32> to vector<8x32xf32>
    %24 = vector.extract_strided_slice %12 {offsets = [0, 96], sizes = [8, 32], strides = [1, 1]} : vector<8x128xf32> to vector<8x32xf32>
    %cst_13 = arith.constant 1.000000e+00 : f32
    %25 = vector.broadcast %cst_13 : f32 to vector<8x32xf32>
    %26 = arith.addf %25, %24 : vector<8x32xf32>
    %cst_14 = arith.constant 5.000000e-01 : f32
    %27 = vector.broadcast %cst_14 : f32 to vector<8x32xf32>
    %28 = arith.mulf %27, %26 : vector<8x32xf32>
    %29 = arith.mulf %22, %0 : vector<8x32xf32>
    %30 = arith.mulf %17, %23 : vector<8x32xf32>
    %31 = arith.addf %29, %30 : vector<8x32xf32>
    %32 = math.tanh %31 : vector<8x32xf32>
    %33 = arith.mulf %28, %32 : vector<8x32xf32>
    %34 = vector.extract_strided_slice %7 {offsets = [8, 0], sizes = [8, 128], strides = [1, 1]} : vector<64x128xf32> to vector<8x128xf32>
    %35 = arith.truncf %33 : vector<8x32xf32> to vector<8x32xbf16>
    %cst_15 = arith.constant dense<0.000000e+00> : vector<8x128xf32>
    %36 = tpu.matmul %35, %4, %cst_15 {dimension_numbers = #tpu.dot_dimension_numbers<[1], [0], [0], [1], [0, 0, 1, 1], [], []>} : vector<8x32xbf16>, vector<32x128xbf16>, vector<8x128xf32> -> vector<8x128xf32>
    %37 = arith.addf %34, %36 : vector<8x128xf32>
    %38 = math.tanh %37 : vector<8x128xf32>
    %39 = vector.extract_strided_slice %38 {offsets = [0, 0], sizes = [8, 32], strides = [1, 1]} : vector<8x128xf32> to vector<8x32xf32>
    %cst_16 = arith.constant 1.000000e+00 : f32
    %40 = vector.broadcast %cst_16 : f32 to vector<8x32xf32>
    %41 = arith.addf %40, %39 : vector<8x32xf32>
    %cst_17 = arith.constant 5.000000e-01 : f32
    %42 = vector.broadcast %cst_17 : f32 to vector<8x32xf32>
    %43 = arith.mulf %42, %41 : vector<8x32xf32>
    %44 = vector.extract_strided_slice %38 {offsets = [0, 32], sizes = [8, 32], strides = [1, 1]} : vector<8x128xf32> to vector<8x32xf32>
    %cst_18 = arith.constant 1.000000e+00 : f32
    %45 = vector.broadcast %cst_18 : f32 to vector<8x32xf32>
    %46 = arith.addf %45, %44 : vector<8x32xf32>
    %cst_19 = arith.constant 5.000000e-01 : f32
    %47 = vector.broadcast %cst_19 : f32 to vector<8x32xf32>
    %48 = arith.mulf %47, %46 : vector<8x32xf32>
    %49 = vector.extract_strided_slice %38 {offsets = [0, 64], sizes = [8, 32], strides = [1, 1]} : vector<8x128xf32> to vector<8x32xf32>
    %50 = vector.extract_strided_slice %38 {offsets = [0, 96], sizes = [8, 32], strides = [1, 1]} : vector<8x128xf32> to vector<8x32xf32>
    %cst_20 = arith.constant 1.000000e+00 : f32
    %51 = vector.broadcast %cst_20 : f32 to vector<8x32xf32>
    %52 = arith.addf %51, %50 : vector<8x32xf32>
    %cst_21 = arith.constant 5.000000e-01 : f32
    %53 = vector.broadcast %cst_21 : f32 to vector<8x32xf32>
    %54 = arith.mulf %53, %52 : vector<8x32xf32>
    %55 = arith.mulf %48, %31 : vector<8x32xf32>
    %56 = arith.mulf %43, %49 : vector<8x32xf32>
    %57 = arith.addf %55, %56 : vector<8x32xf32>
    %58 = math.tanh %57 : vector<8x32xf32>
    %59 = arith.mulf %54, %58 : vector<8x32xf32>
    %60 = vector.extract_strided_slice %7 {offsets = [16, 0], sizes = [8, 128], strides = [1, 1]} : vector<64x128xf32> to vector<8x128xf32>
    %61 = arith.truncf %59 : vector<8x32xf32> to vector<8x32xbf16>
    %cst_22 = arith.constant dense<0.000000e+00> : vector<8x128xf32>
    %62 = tpu.matmul %61, %4, %cst_22 {dimension_numbers = #tpu.dot_dimension_numbers<[1], [0], [0], [1], [0, 0, 1, 1], [], []>} : vector<8x32xbf16>, vector<32x128xbf16>, vector<8x128xf32> -> vector<8x128xf32>
    %63 = arith.addf %60, %62 : vector<8x128xf32>
    %64 = math.tanh %63 : vector<8x128xf32>
    %65 = vector.extract_strided_slice %64 {offsets = [0, 0], sizes = [8, 32], strides = [1, 1]} : vector<8x128xf32> to vector<8x32xf32>
    %cst_23 = arith.constant 1.000000e+00 : f32
    %66 = vector.broadcast %cst_23 : f32 to vector<8x32xf32>
    %67 = arith.addf %66, %65 : vector<8x32xf32>
    %cst_24 = arith.constant 5.000000e-01 : f32
    %68 = vector.broadcast %cst_24 : f32 to vector<8x32xf32>
    %69 = arith.mulf %68, %67 : vector<8x32xf32>
    %70 = vector.extract_strided_slice %64 {offsets = [0, 32], sizes = [8, 32], strides = [1, 1]} : vector<8x128xf32> to vector<8x32xf32>
    %cst_25 = arith.constant 1.000000e+00 : f32
    %71 = vector.broadcast %cst_25 : f32 to vector<8x32xf32>
    %72 = arith.addf %71, %70 : vector<8x32xf32>
    %cst_26 = arith.constant 5.000000e-01 : f32
    %73 = vector.broadcast %cst_26 : f32 to vector<8x32xf32>
    %74 = arith.mulf %73, %72 : vector<8x32xf32>
    %75 = vector.extract_strided_slice %64 {offsets = [0, 64], sizes = [8, 32], strides = [1, 1]} : vector<8x128xf32> to vector<8x32xf32>
    %76 = vector.extract_strided_slice %64 {offsets = [0, 96], sizes = [8, 32], strides = [1, 1]} : vector<8x128xf32> to vector<8x32xf32>
    %cst_27 = arith.constant 1.000000e+00 : f32
    %77 = vector.broadcast %cst_27 : f32 to vector<8x32xf32>
    %78 = arith.addf %77, %76 : vector<8x32xf32>
    %cst_28 = arith.constant 5.000000e-01 : f32
    %79 = vector.broadcast %cst_28 : f32 to vector<8x32xf32>
    %80 = arith.mulf %79, %78 : vector<8x32xf32>
    %81 = arith.mulf %74, %57 : vector<8x32xf32>
    %82 = arith.mulf %69, %75 : vector<8x32xf32>
    %83 = arith.addf %81, %82 : vector<8x32xf32>
    %84 = math.tanh %83 : vector<8x32xf32>
    %85 = arith.mulf %80, %84 : vector<8x32xf32>
    %86 = vector.extract_strided_slice %7 {offsets = [24, 0], sizes = [8, 128], strides = [1, 1]} : vector<64x128xf32> to vector<8x128xf32>
    %87 = arith.truncf %85 : vector<8x32xf32> to vector<8x32xbf16>
    %cst_29 = arith.constant dense<0.000000e+00> : vector<8x128xf32>
    %88 = tpu.matmul %87, %4, %cst_29 {dimension_numbers = #tpu.dot_dimension_numbers<[1], [0], [0], [1], [0, 0, 1, 1], [], []>} : vector<8x32xbf16>, vector<32x128xbf16>, vector<8x128xf32> -> vector<8x128xf32>
    %89 = arith.addf %86, %88 : vector<8x128xf32>
    %90 = math.tanh %89 : vector<8x128xf32>
    %91 = vector.extract_strided_slice %90 {offsets = [0, 0], sizes = [8, 32], strides = [1, 1]} : vector<8x128xf32> to vector<8x32xf32>
    %cst_30 = arith.constant 1.000000e+00 : f32
    %92 = vector.broadcast %cst_30 : f32 to vector<8x32xf32>
    %93 = arith.addf %92, %91 : vector<8x32xf32>
    %cst_31 = arith.constant 5.000000e-01 : f32
    %94 = vector.broadcast %cst_31 : f32 to vector<8x32xf32>
    %95 = arith.mulf %94, %93 : vector<8x32xf32>
    %96 = vector.extract_strided_slice %90 {offsets = [0, 32], sizes = [8, 32], strides = [1, 1]} : vector<8x128xf32> to vector<8x32xf32>
    %cst_32 = arith.constant 1.000000e+00 : f32
    %97 = vector.broadcast %cst_32 : f32 to vector<8x32xf32>
    %98 = arith.addf %97, %96 : vector<8x32xf32>
    %cst_33 = arith.constant 5.000000e-01 : f32
    %99 = vector.broadcast %cst_33 : f32 to vector<8x32xf32>
    %100 = arith.mulf %99, %98 : vector<8x32xf32>
    %101 = vector.extract_strided_slice %90 {offsets = [0, 64], sizes = [8, 32], strides = [1, 1]} : vector<8x128xf32> to vector<8x32xf32>
    %102 = vector.extract_strided_slice %90 {offsets = [0, 96], sizes = [8, 32], strides = [1, 1]} : vector<8x128xf32> to vector<8x32xf32>
    %cst_34 = arith.constant 1.000000e+00 : f32
    %103 = vector.broadcast %cst_34 : f32 to vector<8x32xf32>
    %104 = arith.addf %103, %102 : vector<8x32xf32>
    %cst_35 = arith.constant 5.000000e-01 : f32
    %105 = vector.broadcast %cst_35 : f32 to vector<8x32xf32>
    %106 = arith.mulf %105, %104 : vector<8x32xf32>
    %107 = arith.mulf %100, %83 : vector<8x32xf32>
    %108 = arith.mulf %95, %101 : vector<8x32xf32>
    %109 = arith.addf %107, %108 : vector<8x32xf32>
    %110 = math.tanh %109 : vector<8x32xf32>
    %111 = arith.mulf %106, %110 : vector<8x32xf32>
    %112 = vector.extract_strided_slice %7 {offsets = [32, 0], sizes = [8, 128], strides = [1, 1]} : vector<64x128xf32> to vector<8x128xf32>
    %113 = arith.truncf %111 : vector<8x32xf32> to vector<8x32xbf16>
    %cst_36 = arith.constant dense<0.000000e+00> : vector<8x128xf32>
    %114 = tpu.matmul %113, %4, %cst_36 {dimension_numbers = #tpu.dot_dimension_numbers<[1], [0], [0], [1], [0, 0, 1, 1], [], []>} : vector<8x32xbf16>, vector<32x128xbf16>, vector<8x128xf32> -> vector<8x128xf32>
    %115 = arith.addf %112, %114 : vector<8x128xf32>
    %116 = math.tanh %115 : vector<8x128xf32>
    %117 = vector.extract_strided_slice %116 {offsets = [0, 0], sizes = [8, 32], strides = [1, 1]} : vector<8x128xf32> to vector<8x32xf32>
    %cst_37 = arith.constant 1.000000e+00 : f32
    %118 = vector.broadcast %cst_37 : f32 to vector<8x32xf32>
    %119 = arith.addf %118, %117 : vector<8x32xf32>
    %cst_38 = arith.constant 5.000000e-01 : f32
    %120 = vector.broadcast %cst_38 : f32 to vector<8x32xf32>
    %121 = arith.mulf %120, %119 : vector<8x32xf32>
    %122 = vector.extract_strided_slice %116 {offsets = [0, 32], sizes = [8, 32], strides = [1, 1]} : vector<8x128xf32> to vector<8x32xf32>
    %cst_39 = arith.constant 1.000000e+00 : f32
    %123 = vector.broadcast %cst_39 : f32 to vector<8x32xf32>
    %124 = arith.addf %123, %122 : vector<8x32xf32>
    %cst_40 = arith.constant 5.000000e-01 : f32
    %125 = vector.broadcast %cst_40 : f32 to vector<8x32xf32>
    %126 = arith.mulf %125, %124 : vector<8x32xf32>
    %127 = vector.extract_strided_slice %116 {offsets = [0, 64], sizes = [8, 32], strides = [1, 1]} : vector<8x128xf32> to vector<8x32xf32>
    %128 = vector.extract_strided_slice %116 {offsets = [0, 96], sizes = [8, 32], strides = [1, 1]} : vector<8x128xf32> to vector<8x32xf32>
    %cst_41 = arith.constant 1.000000e+00 : f32
    %129 = vector.broadcast %cst_41 : f32 to vector<8x32xf32>
    %130 = arith.addf %129, %128 : vector<8x32xf32>
    %cst_42 = arith.constant 5.000000e-01 : f32
    %131 = vector.broadcast %cst_42 : f32 to vector<8x32xf32>
    %132 = arith.mulf %131, %130 : vector<8x32xf32>
    %133 = arith.mulf %126, %109 : vector<8x32xf32>
    %134 = arith.mulf %121, %127 : vector<8x32xf32>
    %135 = arith.addf %133, %134 : vector<8x32xf32>
    %136 = math.tanh %135 : vector<8x32xf32>
    %137 = arith.mulf %132, %136 : vector<8x32xf32>
    %138 = vector.extract_strided_slice %7 {offsets = [40, 0], sizes = [8, 128], strides = [1, 1]} : vector<64x128xf32> to vector<8x128xf32>
    %139 = arith.truncf %137 : vector<8x32xf32> to vector<8x32xbf16>
    %cst_43 = arith.constant dense<0.000000e+00> : vector<8x128xf32>
    %140 = tpu.matmul %139, %4, %cst_43 {dimension_numbers = #tpu.dot_dimension_numbers<[1], [0], [0], [1], [0, 0, 1, 1], [], []>} : vector<8x32xbf16>, vector<32x128xbf16>, vector<8x128xf32> -> vector<8x128xf32>
    %141 = arith.addf %138, %140 : vector<8x128xf32>
    %142 = math.tanh %141 : vector<8x128xf32>
    %143 = vector.extract_strided_slice %142 {offsets = [0, 0], sizes = [8, 32], strides = [1, 1]} : vector<8x128xf32> to vector<8x32xf32>
    %cst_44 = arith.constant 1.000000e+00 : f32
    %144 = vector.broadcast %cst_44 : f32 to vector<8x32xf32>
    %145 = arith.addf %144, %143 : vector<8x32xf32>
    %cst_45 = arith.constant 5.000000e-01 : f32
    %146 = vector.broadcast %cst_45 : f32 to vector<8x32xf32>
    %147 = arith.mulf %146, %145 : vector<8x32xf32>
    %148 = vector.extract_strided_slice %142 {offsets = [0, 32], sizes = [8, 32], strides = [1, 1]} : vector<8x128xf32> to vector<8x32xf32>
    %cst_46 = arith.constant 1.000000e+00 : f32
    %149 = vector.broadcast %cst_46 : f32 to vector<8x32xf32>
    %150 = arith.addf %149, %148 : vector<8x32xf32>
    %cst_47 = arith.constant 5.000000e-01 : f32
    %151 = vector.broadcast %cst_47 : f32 to vector<8x32xf32>
    %152 = arith.mulf %151, %150 : vector<8x32xf32>
    %153 = vector.extract_strided_slice %142 {offsets = [0, 64], sizes = [8, 32], strides = [1, 1]} : vector<8x128xf32> to vector<8x32xf32>
    %154 = vector.extract_strided_slice %142 {offsets = [0, 96], sizes = [8, 32], strides = [1, 1]} : vector<8x128xf32> to vector<8x32xf32>
    %cst_48 = arith.constant 1.000000e+00 : f32
    %155 = vector.broadcast %cst_48 : f32 to vector<8x32xf32>
    %156 = arith.addf %155, %154 : vector<8x32xf32>
    %cst_49 = arith.constant 5.000000e-01 : f32
    %157 = vector.broadcast %cst_49 : f32 to vector<8x32xf32>
    %158 = arith.mulf %157, %156 : vector<8x32xf32>
    %159 = arith.mulf %152, %135 : vector<8x32xf32>
    %160 = arith.mulf %147, %153 : vector<8x32xf32>
    %161 = arith.addf %159, %160 : vector<8x32xf32>
    %162 = math.tanh %161 : vector<8x32xf32>
    %163 = arith.mulf %158, %162 : vector<8x32xf32>
    %164 = vector.extract_strided_slice %7 {offsets = [48, 0], sizes = [8, 128], strides = [1, 1]} : vector<64x128xf32> to vector<8x128xf32>
    %165 = arith.truncf %163 : vector<8x32xf32> to vector<8x32xbf16>
    %cst_50 = arith.constant dense<0.000000e+00> : vector<8x128xf32>
    %166 = tpu.matmul %165, %4, %cst_50 {dimension_numbers = #tpu.dot_dimension_numbers<[1], [0], [0], [1], [0, 0, 1, 1], [], []>} : vector<8x32xbf16>, vector<32x128xbf16>, vector<8x128xf32> -> vector<8x128xf32>
    %167 = arith.addf %164, %166 : vector<8x128xf32>
    %168 = math.tanh %167 : vector<8x128xf32>
    %169 = vector.extract_strided_slice %168 {offsets = [0, 0], sizes = [8, 32], strides = [1, 1]} : vector<8x128xf32> to vector<8x32xf32>
    %cst_51 = arith.constant 1.000000e+00 : f32
    %170 = vector.broadcast %cst_51 : f32 to vector<8x32xf32>
    %171 = arith.addf %170, %169 : vector<8x32xf32>
    %cst_52 = arith.constant 5.000000e-01 : f32
    %172 = vector.broadcast %cst_52 : f32 to vector<8x32xf32>
    %173 = arith.mulf %172, %171 : vector<8x32xf32>
    %174 = vector.extract_strided_slice %168 {offsets = [0, 32], sizes = [8, 32], strides = [1, 1]} : vector<8x128xf32> to vector<8x32xf32>
    %cst_53 = arith.constant 1.000000e+00 : f32
    %175 = vector.broadcast %cst_53 : f32 to vector<8x32xf32>
    %176 = arith.addf %175, %174 : vector<8x32xf32>
    %cst_54 = arith.constant 5.000000e-01 : f32
    %177 = vector.broadcast %cst_54 : f32 to vector<8x32xf32>
    %178 = arith.mulf %177, %176 : vector<8x32xf32>
    %179 = vector.extract_strided_slice %168 {offsets = [0, 64], sizes = [8, 32], strides = [1, 1]} : vector<8x128xf32> to vector<8x32xf32>
    %180 = vector.extract_strided_slice %168 {offsets = [0, 96], sizes = [8, 32], strides = [1, 1]} : vector<8x128xf32> to vector<8x32xf32>
    %cst_55 = arith.constant 1.000000e+00 : f32
    %181 = vector.broadcast %cst_55 : f32 to vector<8x32xf32>
    %182 = arith.addf %181, %180 : vector<8x32xf32>
    %cst_56 = arith.constant 5.000000e-01 : f32
    %183 = vector.broadcast %cst_56 : f32 to vector<8x32xf32>
    %184 = arith.mulf %183, %182 : vector<8x32xf32>
    %185 = arith.mulf %178, %161 : vector<8x32xf32>
    %186 = arith.mulf %173, %179 : vector<8x32xf32>
    %187 = arith.addf %185, %186 : vector<8x32xf32>
    %188 = math.tanh %187 : vector<8x32xf32>
    %189 = arith.mulf %184, %188 : vector<8x32xf32>
    %190 = vector.extract_strided_slice %7 {offsets = [56, 0], sizes = [8, 128], strides = [1, 1]} : vector<64x128xf32> to vector<8x128xf32>
    %191 = arith.truncf %189 : vector<8x32xf32> to vector<8x32xbf16>
    %cst_57 = arith.constant dense<0.000000e+00> : vector<8x128xf32>
    %192 = tpu.matmul %191, %4, %cst_57 {dimension_numbers = #tpu.dot_dimension_numbers<[1], [0], [0], [1], [0, 0, 1, 1], [], []>} : vector<8x32xbf16>, vector<32x128xbf16>, vector<8x128xf32> -> vector<8x128xf32>
    %193 = arith.addf %190, %192 : vector<8x128xf32>
    %194 = math.tanh %193 : vector<8x128xf32>
    %195 = vector.extract_strided_slice %194 {offsets = [0, 0], sizes = [8, 32], strides = [1, 1]} : vector<8x128xf32> to vector<8x32xf32>
    %cst_58 = arith.constant 1.000000e+00 : f32
    %196 = vector.broadcast %cst_58 : f32 to vector<8x32xf32>
    %197 = arith.addf %196, %195 : vector<8x32xf32>
    %cst_59 = arith.constant 5.000000e-01 : f32
    %198 = vector.broadcast %cst_59 : f32 to vector<8x32xf32>
    %199 = arith.mulf %198, %197 : vector<8x32xf32>
    %200 = vector.extract_strided_slice %194 {offsets = [0, 32], sizes = [8, 32], strides = [1, 1]} : vector<8x128xf32> to vector<8x32xf32>
    %cst_60 = arith.constant 1.000000e+00 : f32
    %201 = vector.broadcast %cst_60 : f32 to vector<8x32xf32>
    %202 = arith.addf %201, %200 : vector<8x32xf32>
    %cst_61 = arith.constant 5.000000e-01 : f32
    %203 = vector.broadcast %cst_61 : f32 to vector<8x32xf32>
    %204 = arith.mulf %203, %202 : vector<8x32xf32>
    %205 = vector.extract_strided_slice %194 {offsets = [0, 64], sizes = [8, 32], strides = [1, 1]} : vector<8x128xf32> to vector<8x32xf32>
    %206 = vector.extract_strided_slice %194 {offsets = [0, 96], sizes = [8, 32], strides = [1, 1]} : vector<8x128xf32> to vector<8x32xf32>
    %cst_62 = arith.constant 1.000000e+00 : f32
    %207 = vector.broadcast %cst_62 : f32 to vector<8x32xf32>
    %208 = arith.addf %207, %206 : vector<8x32xf32>
    %cst_63 = arith.constant 5.000000e-01 : f32
    %209 = vector.broadcast %cst_63 : f32 to vector<8x32xf32>
    %210 = arith.mulf %209, %208 : vector<8x32xf32>
    %211 = arith.mulf %204, %187 : vector<8x32xf32>
    %212 = arith.mulf %199, %205 : vector<8x32xf32>
    %213 = arith.addf %211, %212 : vector<8x32xf32>
    %214 = math.tanh %213 : vector<8x32xf32>
    %215 = arith.mulf %210, %214 : vector<8x32xf32>
    %216 = tpu.concatenate %33, %59, %85, %111, %137, %163, %189, %215 in 0 : vector<8x32xf32>, vector<8x32xf32>, vector<8x32xf32>, vector<8x32xf32>, vector<8x32xf32>, vector<8x32xf32>, vector<8x32xf32>, vector<8x32xf32> -> vector<64x32xf32>
    %217 = arith.truncf %216 : vector<64x32xf32> to vector<64x32xbf16>
    %c0_64 = arith.constant 0 : index
    %c0_65 = arith.constant 0 : index
    %218 = vector.load %arg4[%c0_64, %c0_65] : memref<32x128xbf16, #tpu.memory_space<vmem>>, vector<32x128xbf16>
    %c0_66 = arith.constant 0 : index
    %c0_67 = arith.constant 0 : index
    %219 = vector.load %arg5[%c0_66, %c0_67] : memref<1x128xf32, #tpu.memory_space<vmem>>, vector<1x128xf32>
    %c0_68 = arith.constant 0 : index
    %c0_69 = arith.constant 0 : index
    %220 = vector.load %arg6[%c0_68, %c0_69] : memref<32x128xbf16, #tpu.memory_space<vmem>>, vector<32x128xbf16>
    %cst_70 = arith.constant dense<0.000000e+00> : vector<64x128xf32>
    %221 = tpu.matmul %217, %218, %cst_70 {dimension_numbers = #tpu.dot_dimension_numbers<[1], [0], [0], [1], [0, 0, 1, 1], [], []>} : vector<64x32xbf16>, vector<32x128xbf16>, vector<64x128xf32> -> vector<64x128xf32>
    %222 = vector.broadcast %219 : vector<1x128xf32> to vector<64x128xf32>
    %223 = arith.addf %221, %222 : vector<64x128xf32>
    %224 = vector.extract_strided_slice %223 {offsets = [0, 0], sizes = [8, 128], strides = [1, 1]} : vector<64x128xf32> to vector<8x128xf32>
    %225 = arith.truncf %0 : vector<8x32xf32> to vector<8x32xbf16>
    %cst_71 = arith.constant dense<0.000000e+00> : vector<8x128xf32>
    %226 = tpu.matmul %225, %220, %cst_71 {dimension_numbers = #tpu.dot_dimension_numbers<[1], [0], [0], [1], [0, 0, 1, 1], [], []>} : vector<8x32xbf16>, vector<32x128xbf16>, vector<8x128xf32> -> vector<8x128xf32>
    %227 = arith.addf %224, %226 : vector<8x128xf32>
    %228 = math.tanh %227 : vector<8x128xf32>
    %229 = vector.extract_strided_slice %228 {offsets = [0, 0], sizes = [8, 32], strides = [1, 1]} : vector<8x128xf32> to vector<8x32xf32>
    %cst_72 = arith.constant 1.000000e+00 : f32
    %230 = vector.broadcast %cst_72 : f32 to vector<8x32xf32>
    %231 = arith.addf %230, %229 : vector<8x32xf32>
    %cst_73 = arith.constant 5.000000e-01 : f32
    %232 = vector.broadcast %cst_73 : f32 to vector<8x32xf32>
    %233 = arith.mulf %232, %231 : vector<8x32xf32>
    %234 = vector.extract_strided_slice %228 {offsets = [0, 32], sizes = [8, 32], strides = [1, 1]} : vector<8x128xf32> to vector<8x32xf32>
    %cst_74 = arith.constant 1.000000e+00 : f32
    %235 = vector.broadcast %cst_74 : f32 to vector<8x32xf32>
    %236 = arith.addf %235, %234 : vector<8x32xf32>
    %cst_75 = arith.constant 5.000000e-01 : f32
    %237 = vector.broadcast %cst_75 : f32 to vector<8x32xf32>
    %238 = arith.mulf %237, %236 : vector<8x32xf32>
    %239 = vector.extract_strided_slice %228 {offsets = [0, 64], sizes = [8, 32], strides = [1, 1]} : vector<8x128xf32> to vector<8x32xf32>
    %240 = vector.extract_strided_slice %228 {offsets = [0, 96], sizes = [8, 32], strides = [1, 1]} : vector<8x128xf32> to vector<8x32xf32>
    %cst_76 = arith.constant 1.000000e+00 : f32
    %241 = vector.broadcast %cst_76 : f32 to vector<8x32xf32>
    %242 = arith.addf %241, %240 : vector<8x32xf32>
    %cst_77 = arith.constant 5.000000e-01 : f32
    %243 = vector.broadcast %cst_77 : f32 to vector<8x32xf32>
    %244 = arith.mulf %243, %242 : vector<8x32xf32>
    %245 = arith.mulf %238, %0 : vector<8x32xf32>
    %246 = arith.mulf %233, %239 : vector<8x32xf32>
    %247 = arith.addf %245, %246 : vector<8x32xf32>
    %248 = math.tanh %247 : vector<8x32xf32>
    %249 = arith.mulf %244, %248 : vector<8x32xf32>
    %250 = vector.extract_strided_slice %223 {offsets = [8, 0], sizes = [8, 128], strides = [1, 1]} : vector<64x128xf32> to vector<8x128xf32>
    %251 = arith.truncf %249 : vector<8x32xf32> to vector<8x32xbf16>
    %cst_78 = arith.constant dense<0.000000e+00> : vector<8x128xf32>
    %252 = tpu.matmul %251, %220, %cst_78 {dimension_numbers = #tpu.dot_dimension_numbers<[1], [0], [0], [1], [0, 0, 1, 1], [], []>} : vector<8x32xbf16>, vector<32x128xbf16>, vector<8x128xf32> -> vector<8x128xf32>
    %253 = arith.addf %250, %252 : vector<8x128xf32>
    %254 = math.tanh %253 : vector<8x128xf32>
    %255 = vector.extract_strided_slice %254 {offsets = [0, 0], sizes = [8, 32], strides = [1, 1]} : vector<8x128xf32> to vector<8x32xf32>
    %cst_79 = arith.constant 1.000000e+00 : f32
    %256 = vector.broadcast %cst_79 : f32 to vector<8x32xf32>
    %257 = arith.addf %256, %255 : vector<8x32xf32>
    %cst_80 = arith.constant 5.000000e-01 : f32
    %258 = vector.broadcast %cst_80 : f32 to vector<8x32xf32>
    %259 = arith.mulf %258, %257 : vector<8x32xf32>
    %260 = vector.extract_strided_slice %254 {offsets = [0, 32], sizes = [8, 32], strides = [1, 1]} : vector<8x128xf32> to vector<8x32xf32>
    %cst_81 = arith.constant 1.000000e+00 : f32
    %261 = vector.broadcast %cst_81 : f32 to vector<8x32xf32>
    %262 = arith.addf %261, %260 : vector<8x32xf32>
    %cst_82 = arith.constant 5.000000e-01 : f32
    %263 = vector.broadcast %cst_82 : f32 to vector<8x32xf32>
    %264 = arith.mulf %263, %262 : vector<8x32xf32>
    %265 = vector.extract_strided_slice %254 {offsets = [0, 64], sizes = [8, 32], strides = [1, 1]} : vector<8x128xf32> to vector<8x32xf32>
    %266 = vector.extract_strided_slice %254 {offsets = [0, 96], sizes = [8, 32], strides = [1, 1]} : vector<8x128xf32> to vector<8x32xf32>
    %cst_83 = arith.constant 1.000000e+00 : f32
    %267 = vector.broadcast %cst_83 : f32 to vector<8x32xf32>
    %268 = arith.addf %267, %266 : vector<8x32xf32>
    %cst_84 = arith.constant 5.000000e-01 : f32
    %269 = vector.broadcast %cst_84 : f32 to vector<8x32xf32>
    %270 = arith.mulf %269, %268 : vector<8x32xf32>
    %271 = arith.mulf %264, %247 : vector<8x32xf32>
    %272 = arith.mulf %259, %265 : vector<8x32xf32>
    %273 = arith.addf %271, %272 : vector<8x32xf32>
    %274 = math.tanh %273 : vector<8x32xf32>
    %275 = arith.mulf %270, %274 : vector<8x32xf32>
    %276 = vector.extract_strided_slice %223 {offsets = [16, 0], sizes = [8, 128], strides = [1, 1]} : vector<64x128xf32> to vector<8x128xf32>
    %277 = arith.truncf %275 : vector<8x32xf32> to vector<8x32xbf16>
    %cst_85 = arith.constant dense<0.000000e+00> : vector<8x128xf32>
    %278 = tpu.matmul %277, %220, %cst_85 {dimension_numbers = #tpu.dot_dimension_numbers<[1], [0], [0], [1], [0, 0, 1, 1], [], []>} : vector<8x32xbf16>, vector<32x128xbf16>, vector<8x128xf32> -> vector<8x128xf32>
    %279 = arith.addf %276, %278 : vector<8x128xf32>
    %280 = math.tanh %279 : vector<8x128xf32>
    %281 = vector.extract_strided_slice %280 {offsets = [0, 0], sizes = [8, 32], strides = [1, 1]} : vector<8x128xf32> to vector<8x32xf32>
    %cst_86 = arith.constant 1.000000e+00 : f32
    %282 = vector.broadcast %cst_86 : f32 to vector<8x32xf32>
    %283 = arith.addf %282, %281 : vector<8x32xf32>
    %cst_87 = arith.constant 5.000000e-01 : f32
    %284 = vector.broadcast %cst_87 : f32 to vector<8x32xf32>
    %285 = arith.mulf %284, %283 : vector<8x32xf32>
    %286 = vector.extract_strided_slice %280 {offsets = [0, 32], sizes = [8, 32], strides = [1, 1]} : vector<8x128xf32> to vector<8x32xf32>
    %cst_88 = arith.constant 1.000000e+00 : f32
    %287 = vector.broadcast %cst_88 : f32 to vector<8x32xf32>
    %288 = arith.addf %287, %286 : vector<8x32xf32>
    %cst_89 = arith.constant 5.000000e-01 : f32
    %289 = vector.broadcast %cst_89 : f32 to vector<8x32xf32>
    %290 = arith.mulf %289, %288 : vector<8x32xf32>
    %291 = vector.extract_strided_slice %280 {offsets = [0, 64], sizes = [8, 32], strides = [1, 1]} : vector<8x128xf32> to vector<8x32xf32>
    %292 = vector.extract_strided_slice %280 {offsets = [0, 96], sizes = [8, 32], strides = [1, 1]} : vector<8x128xf32> to vector<8x32xf32>
    %cst_90 = arith.constant 1.000000e+00 : f32
    %293 = vector.broadcast %cst_90 : f32 to vector<8x32xf32>
    %294 = arith.addf %293, %292 : vector<8x32xf32>
    %cst_91 = arith.constant 5.000000e-01 : f32
    %295 = vector.broadcast %cst_91 : f32 to vector<8x32xf32>
    %296 = arith.mulf %295, %294 : vector<8x32xf32>
    %297 = arith.mulf %290, %273 : vector<8x32xf32>
    %298 = arith.mulf %285, %291 : vector<8x32xf32>
    %299 = arith.addf %297, %298 : vector<8x32xf32>
    %300 = math.tanh %299 : vector<8x32xf32>
    %301 = arith.mulf %296, %300 : vector<8x32xf32>
    %302 = vector.extract_strided_slice %223 {offsets = [24, 0], sizes = [8, 128], strides = [1, 1]} : vector<64x128xf32> to vector<8x128xf32>
    %303 = arith.truncf %301 : vector<8x32xf32> to vector<8x32xbf16>
    %cst_92 = arith.constant dense<0.000000e+00> : vector<8x128xf32>
    %304 = tpu.matmul %303, %220, %cst_92 {dimension_numbers = #tpu.dot_dimension_numbers<[1], [0], [0], [1], [0, 0, 1, 1], [], []>} : vector<8x32xbf16>, vector<32x128xbf16>, vector<8x128xf32> -> vector<8x128xf32>
    %305 = arith.addf %302, %304 : vector<8x128xf32>
    %306 = math.tanh %305 : vector<8x128xf32>
    %307 = vector.extract_strided_slice %306 {offsets = [0, 0], sizes = [8, 32], strides = [1, 1]} : vector<8x128xf32> to vector<8x32xf32>
    %cst_93 = arith.constant 1.000000e+00 : f32
    %308 = vector.broadcast %cst_93 : f32 to vector<8x32xf32>
    %309 = arith.addf %308, %307 : vector<8x32xf32>
    %cst_94 = arith.constant 5.000000e-01 : f32
    %310 = vector.broadcast %cst_94 : f32 to vector<8x32xf32>
    %311 = arith.mulf %310, %309 : vector<8x32xf32>
    %312 = vector.extract_strided_slice %306 {offsets = [0, 32], sizes = [8, 32], strides = [1, 1]} : vector<8x128xf32> to vector<8x32xf32>
    %cst_95 = arith.constant 1.000000e+00 : f32
    %313 = vector.broadcast %cst_95 : f32 to vector<8x32xf32>
    %314 = arith.addf %313, %312 : vector<8x32xf32>
    %cst_96 = arith.constant 5.000000e-01 : f32
    %315 = vector.broadcast %cst_96 : f32 to vector<8x32xf32>
    %316 = arith.mulf %315, %314 : vector<8x32xf32>
    %317 = vector.extract_strided_slice %306 {offsets = [0, 64], sizes = [8, 32], strides = [1, 1]} : vector<8x128xf32> to vector<8x32xf32>
    %318 = vector.extract_strided_slice %306 {offsets = [0, 96], sizes = [8, 32], strides = [1, 1]} : vector<8x128xf32> to vector<8x32xf32>
    %cst_97 = arith.constant 1.000000e+00 : f32
    %319 = vector.broadcast %cst_97 : f32 to vector<8x32xf32>
    %320 = arith.addf %319, %318 : vector<8x32xf32>
    %cst_98 = arith.constant 5.000000e-01 : f32
    %321 = vector.broadcast %cst_98 : f32 to vector<8x32xf32>
    %322 = arith.mulf %321, %320 : vector<8x32xf32>
    %323 = arith.mulf %316, %299 : vector<8x32xf32>
    %324 = arith.mulf %311, %317 : vector<8x32xf32>
    %325 = arith.addf %323, %324 : vector<8x32xf32>
    %326 = math.tanh %325 : vector<8x32xf32>
    %327 = arith.mulf %322, %326 : vector<8x32xf32>
    %328 = vector.extract_strided_slice %223 {offsets = [32, 0], sizes = [8, 128], strides = [1, 1]} : vector<64x128xf32> to vector<8x128xf32>
    %329 = arith.truncf %327 : vector<8x32xf32> to vector<8x32xbf16>
    %cst_99 = arith.constant dense<0.000000e+00> : vector<8x128xf32>
    %330 = tpu.matmul %329, %220, %cst_99 {dimension_numbers = #tpu.dot_dimension_numbers<[1], [0], [0], [1], [0, 0, 1, 1], [], []>} : vector<8x32xbf16>, vector<32x128xbf16>, vector<8x128xf32> -> vector<8x128xf32>
    %331 = arith.addf %328, %330 : vector<8x128xf32>
    %332 = math.tanh %331 : vector<8x128xf32>
    %333 = vector.extract_strided_slice %332 {offsets = [0, 0], sizes = [8, 32], strides = [1, 1]} : vector<8x128xf32> to vector<8x32xf32>
    %cst_100 = arith.constant 1.000000e+00 : f32
    %334 = vector.broadcast %cst_100 : f32 to vector<8x32xf32>
    %335 = arith.addf %334, %333 : vector<8x32xf32>
    %cst_101 = arith.constant 5.000000e-01 : f32
    %336 = vector.broadcast %cst_101 : f32 to vector<8x32xf32>
    %337 = arith.mulf %336, %335 : vector<8x32xf32>
    %338 = vector.extract_strided_slice %332 {offsets = [0, 32], sizes = [8, 32], strides = [1, 1]} : vector<8x128xf32> to vector<8x32xf32>
    %cst_102 = arith.constant 1.000000e+00 : f32
    %339 = vector.broadcast %cst_102 : f32 to vector<8x32xf32>
    %340 = arith.addf %339, %338 : vector<8x32xf32>
    %cst_103 = arith.constant 5.000000e-01 : f32
    %341 = vector.broadcast %cst_103 : f32 to vector<8x32xf32>
    %342 = arith.mulf %341, %340 : vector<8x32xf32>
    %343 = vector.extract_strided_slice %332 {offsets = [0, 64], sizes = [8, 32], strides = [1, 1]} : vector<8x128xf32> to vector<8x32xf32>
    %344 = vector.extract_strided_slice %332 {offsets = [0, 96], sizes = [8, 32], strides = [1, 1]} : vector<8x128xf32> to vector<8x32xf32>
    %cst_104 = arith.constant 1.000000e+00 : f32
    %345 = vector.broadcast %cst_104 : f32 to vector<8x32xf32>
    %346 = arith.addf %345, %344 : vector<8x32xf32>
    %cst_105 = arith.constant 5.000000e-01 : f32
    %347 = vector.broadcast %cst_105 : f32 to vector<8x32xf32>
    %348 = arith.mulf %347, %346 : vector<8x32xf32>
    %349 = arith.mulf %342, %325 : vector<8x32xf32>
    %350 = arith.mulf %337, %343 : vector<8x32xf32>
    %351 = arith.addf %349, %350 : vector<8x32xf32>
    %352 = math.tanh %351 : vector<8x32xf32>
    %353 = arith.mulf %348, %352 : vector<8x32xf32>
    %354 = vector.extract_strided_slice %223 {offsets = [40, 0], sizes = [8, 128], strides = [1, 1]} : vector<64x128xf32> to vector<8x128xf32>
    %355 = arith.truncf %353 : vector<8x32xf32> to vector<8x32xbf16>
    %cst_106 = arith.constant dense<0.000000e+00> : vector<8x128xf32>
    %356 = tpu.matmul %355, %220, %cst_106 {dimension_numbers = #tpu.dot_dimension_numbers<[1], [0], [0], [1], [0, 0, 1, 1], [], []>} : vector<8x32xbf16>, vector<32x128xbf16>, vector<8x128xf32> -> vector<8x128xf32>
    %357 = arith.addf %354, %356 : vector<8x128xf32>
    %358 = math.tanh %357 : vector<8x128xf32>
    %359 = vector.extract_strided_slice %358 {offsets = [0, 0], sizes = [8, 32], strides = [1, 1]} : vector<8x128xf32> to vector<8x32xf32>
    %cst_107 = arith.constant 1.000000e+00 : f32
    %360 = vector.broadcast %cst_107 : f32 to vector<8x32xf32>
    %361 = arith.addf %360, %359 : vector<8x32xf32>
    %cst_108 = arith.constant 5.000000e-01 : f32
    %362 = vector.broadcast %cst_108 : f32 to vector<8x32xf32>
    %363 = arith.mulf %362, %361 : vector<8x32xf32>
    %364 = vector.extract_strided_slice %358 {offsets = [0, 32], sizes = [8, 32], strides = [1, 1]} : vector<8x128xf32> to vector<8x32xf32>
    %cst_109 = arith.constant 1.000000e+00 : f32
    %365 = vector.broadcast %cst_109 : f32 to vector<8x32xf32>
    %366 = arith.addf %365, %364 : vector<8x32xf32>
    %cst_110 = arith.constant 5.000000e-01 : f32
    %367 = vector.broadcast %cst_110 : f32 to vector<8x32xf32>
    %368 = arith.mulf %367, %366 : vector<8x32xf32>
    %369 = vector.extract_strided_slice %358 {offsets = [0, 64], sizes = [8, 32], strides = [1, 1]} : vector<8x128xf32> to vector<8x32xf32>
    %370 = vector.extract_strided_slice %358 {offsets = [0, 96], sizes = [8, 32], strides = [1, 1]} : vector<8x128xf32> to vector<8x32xf32>
    %cst_111 = arith.constant 1.000000e+00 : f32
    %371 = vector.broadcast %cst_111 : f32 to vector<8x32xf32>
    %372 = arith.addf %371, %370 : vector<8x32xf32>
    %cst_112 = arith.constant 5.000000e-01 : f32
    %373 = vector.broadcast %cst_112 : f32 to vector<8x32xf32>
    %374 = arith.mulf %373, %372 : vector<8x32xf32>
    %375 = arith.mulf %368, %351 : vector<8x32xf32>
    %376 = arith.mulf %363, %369 : vector<8x32xf32>
    %377 = arith.addf %375, %376 : vector<8x32xf32>
    %378 = math.tanh %377 : vector<8x32xf32>
    %379 = arith.mulf %374, %378 : vector<8x32xf32>
    %380 = vector.extract_strided_slice %223 {offsets = [48, 0], sizes = [8, 128], strides = [1, 1]} : vector<64x128xf32> to vector<8x128xf32>
    %381 = arith.truncf %379 : vector<8x32xf32> to vector<8x32xbf16>
    %cst_113 = arith.constant dense<0.000000e+00> : vector<8x128xf32>
    %382 = tpu.matmul %381, %220, %cst_113 {dimension_numbers = #tpu.dot_dimension_numbers<[1], [0], [0], [1], [0, 0, 1, 1], [], []>} : vector<8x32xbf16>, vector<32x128xbf16>, vector<8x128xf32> -> vector<8x128xf32>
    %383 = arith.addf %380, %382 : vector<8x128xf32>
    %384 = math.tanh %383 : vector<8x128xf32>
    %385 = vector.extract_strided_slice %384 {offsets = [0, 0], sizes = [8, 32], strides = [1, 1]} : vector<8x128xf32> to vector<8x32xf32>
    %cst_114 = arith.constant 1.000000e+00 : f32
    %386 = vector.broadcast %cst_114 : f32 to vector<8x32xf32>
    %387 = arith.addf %386, %385 : vector<8x32xf32>
    %cst_115 = arith.constant 5.000000e-01 : f32
    %388 = vector.broadcast %cst_115 : f32 to vector<8x32xf32>
    %389 = arith.mulf %388, %387 : vector<8x32xf32>
    %390 = vector.extract_strided_slice %384 {offsets = [0, 32], sizes = [8, 32], strides = [1, 1]} : vector<8x128xf32> to vector<8x32xf32>
    %cst_116 = arith.constant 1.000000e+00 : f32
    %391 = vector.broadcast %cst_116 : f32 to vector<8x32xf32>
    %392 = arith.addf %391, %390 : vector<8x32xf32>
    %cst_117 = arith.constant 5.000000e-01 : f32
    %393 = vector.broadcast %cst_117 : f32 to vector<8x32xf32>
    %394 = arith.mulf %393, %392 : vector<8x32xf32>
    %395 = vector.extract_strided_slice %384 {offsets = [0, 64], sizes = [8, 32], strides = [1, 1]} : vector<8x128xf32> to vector<8x32xf32>
    %396 = vector.extract_strided_slice %384 {offsets = [0, 96], sizes = [8, 32], strides = [1, 1]} : vector<8x128xf32> to vector<8x32xf32>
    %cst_118 = arith.constant 1.000000e+00 : f32
    %397 = vector.broadcast %cst_118 : f32 to vector<8x32xf32>
    %398 = arith.addf %397, %396 : vector<8x32xf32>
    %cst_119 = arith.constant 5.000000e-01 : f32
    %399 = vector.broadcast %cst_119 : f32 to vector<8x32xf32>
    %400 = arith.mulf %399, %398 : vector<8x32xf32>
    %401 = arith.mulf %394, %377 : vector<8x32xf32>
    %402 = arith.mulf %389, %395 : vector<8x32xf32>
    %403 = arith.addf %401, %402 : vector<8x32xf32>
    %404 = math.tanh %403 : vector<8x32xf32>
    %405 = arith.mulf %400, %404 : vector<8x32xf32>
    %406 = vector.extract_strided_slice %223 {offsets = [56, 0], sizes = [8, 128], strides = [1, 1]} : vector<64x128xf32> to vector<8x128xf32>
    %407 = arith.truncf %405 : vector<8x32xf32> to vector<8x32xbf16>
    %cst_120 = arith.constant dense<0.000000e+00> : vector<8x128xf32>
    %408 = tpu.matmul %407, %220, %cst_120 {dimension_numbers = #tpu.dot_dimension_numbers<[1], [0], [0], [1], [0, 0, 1, 1], [], []>} : vector<8x32xbf16>, vector<32x128xbf16>, vector<8x128xf32> -> vector<8x128xf32>
    %409 = arith.addf %406, %408 : vector<8x128xf32>
    %410 = math.tanh %409 : vector<8x128xf32>
    %411 = vector.extract_strided_slice %410 {offsets = [0, 0], sizes = [8, 32], strides = [1, 1]} : vector<8x128xf32> to vector<8x32xf32>
    %cst_121 = arith.constant 1.000000e+00 : f32
    %412 = vector.broadcast %cst_121 : f32 to vector<8x32xf32>
    %413 = arith.addf %412, %411 : vector<8x32xf32>
    %cst_122 = arith.constant 5.000000e-01 : f32
    %414 = vector.broadcast %cst_122 : f32 to vector<8x32xf32>
    %415 = arith.mulf %414, %413 : vector<8x32xf32>
    %416 = vector.extract_strided_slice %410 {offsets = [0, 32], sizes = [8, 32], strides = [1, 1]} : vector<8x128xf32> to vector<8x32xf32>
    %cst_123 = arith.constant 1.000000e+00 : f32
    %417 = vector.broadcast %cst_123 : f32 to vector<8x32xf32>
    %418 = arith.addf %417, %416 : vector<8x32xf32>
    %cst_124 = arith.constant 5.000000e-01 : f32
    %419 = vector.broadcast %cst_124 : f32 to vector<8x32xf32>
    %420 = arith.mulf %419, %418 : vector<8x32xf32>
    %421 = vector.extract_strided_slice %410 {offsets = [0, 64], sizes = [8, 32], strides = [1, 1]} : vector<8x128xf32> to vector<8x32xf32>
    %422 = vector.extract_strided_slice %410 {offsets = [0, 96], sizes = [8, 32], strides = [1, 1]} : vector<8x128xf32> to vector<8x32xf32>
    %cst_125 = arith.constant 1.000000e+00 : f32
    %423 = vector.broadcast %cst_125 : f32 to vector<8x32xf32>
    %424 = arith.addf %423, %422 : vector<8x32xf32>
    %cst_126 = arith.constant 5.000000e-01 : f32
    %425 = vector.broadcast %cst_126 : f32 to vector<8x32xf32>
    %426 = arith.mulf %425, %424 : vector<8x32xf32>
    %427 = arith.mulf %420, %403 : vector<8x32xf32>
    %428 = arith.mulf %415, %421 : vector<8x32xf32>
    %429 = arith.addf %427, %428 : vector<8x32xf32>
    %430 = math.tanh %429 : vector<8x32xf32>
    %431 = arith.mulf %426, %430 : vector<8x32xf32>
    %432 = arith.truncf %431 : vector<8x32xf32> to vector<8x32xbf16>
    %c0_127 = arith.constant 0 : index
    %c0_128 = arith.constant 0 : index
    %433 = vector.load %arg7[%c0_127, %c0_128] : memref<32x16xbf16, #tpu.memory_space<vmem>>, vector<32x16xbf16>
    %cst_129 = arith.constant dense<0.000000e+00> : vector<8x16xf32>
    %434 = tpu.matmul %432, %433, %cst_129 {dimension_numbers = #tpu.dot_dimension_numbers<[1], [0], [0], [1], [0, 0, 1, 1], [], []>} : vector<8x32xbf16>, vector<32x16xbf16>, vector<8x16xf32> -> vector<8x16xf32>
    %c0_130 = arith.constant 0 : index
    %c0_131 = arith.constant 0 : index
    %435 = vector.load %arg8[%c0_130, %c0_131] : memref<1x16xf32, #tpu.memory_space<vmem>>, vector<1x16xf32>
    %436 = vector.broadcast %435 : vector<1x16xf32> to vector<8x16xf32>
    %437 = arith.addf %434, %436 : vector<8x16xf32>
    %c0_132 = arith.constant 0 : index
    %c0_133 = arith.constant 0 : index
    %438 = vector.load %arg9[%c0_132, %c0_133] : memref<8x16xf32, #tpu.memory_space<vmem>>, vector<8x16xf32>
    tpu.vector_store %arg9[%c0_132, %c0_133], %437 {strides = array<i32>} : memref<8x16xf32, #tpu.memory_space<vmem>>, vector<8x16xf32>,
    return
  }
}

</mosaic_0001>

<bundles_post_ra>
// kernel: char_model_forward.1
= control target key start
LH: loop header
LB: loop body
LE: loop exit
PB: predicated region body
PF: predicated region fallthrough
CT: control target
= control target key end

     0   :  { %v1796_v0 = vmov 0.0   ;;  %vm1797_vm0 = vmmov 0   ;;  %vm80_vm1 = vcmask 130048   ;;  %v1798_v6 = vmov 0   ;;  %s1799_s19 = smov 64   ;;  %s2198_s1 = inlined_call_operand.vmem [shape: bf16[16,128], index: 1, kind: input, shape index: {}]   ;;  %s2199_s3 = inlined_call_operand.vmem [shape: bf16[32,128], index: 3, kind: input, shape index: {}]   ;;  %s2200_s0 = inlined_call_operand.vmem [shape: bf16[64,16], index: 0, kind: input, shape index: {}]   ;;  %s2201_s2 = inlined_call_operand.vmem [shape: f32[1,128], index: 2, kind: input, shape index: {}]   ;;  %s2202_s4 = inlined_call_operand.vmem [shape: bf16[32,128], index: 4, kind: input, shape index: {}]   ;;  %s2203_s6 = inlined_call_operand.vmem [shape: bf16[32,128], index: 6, kind: input, shape index: {}]   ;;  %s2204_s5 = inlined_call_operand.vmem [shape: f32[1,128], index: 5, kind: input, shape index: {}]   ;;  %s2205_s7 = inlined_call_operand.vmem [shape: bf16[32,16], index: 7, kind: input, shape index: {}]   ;;  %s2206_s8 = inlined_call_operand.vmem [shape: f32[1,16], index: 8, kind: input, shape index: {}]   ;;  %s2207_s9 = inlined_call_operand.vmem [shape: f32[8,16], index: 9, kind: output, shape index: {}]  }
   0x1   :  { %1566 = vmatprep.subr.bf16.mxu1 %v1796_v0  ;;  %v1719_v1 = vld [vmem:[%s2198_s1] sm:$0xff]   ;;  %1570 = vmatprep.mubr.msk.bf16.mxu1 %vm1797_vm0, %v1796_v0  ;;  %v1722_v4 = vld [vmem:[%s2200_s0 + $0x8] sm:$0xff]   ;;  %vm170_vm2 = vcmask 261120   ;;  %v1724_v45 = vld [vmem:[%s2200_s0 + $0x10] sm:$0xff]  }
   0x2   :  { %v1860_v2 = vld [vmem:[%s2199_s3] sm:$0xff]   ;;  %1556 = vmatprep.subr.bf16.mxu0 %v1719_v1  ;;  %v1874_v5 = vld [vmem:[%s2199_s3 + $0x8] sm:$0xff]   ;;  %v1725_v46 = vld [vmem:[%s2200_s0 + $0x18] sm:$0xff]  }
   0x3   :  { %v1721_v3 = vld [vmem:[%s2200_s0] sm:$0xff]   ;;  %1567 = vmatpush3.bf16.msra.mxu1 %v1860_v2  ;;  %1557 = vmatpush3.bf16.msra.mxu0 %v1719_v1 }
   0x4   :  { %1558 = vmatprep.mubr.msk.bf16.mxu0 %vm80_vm1, %v1721_v3  ;;  %1568 = vmatprep.subr.bf16.mxu1 %v1796_v0  ;;  %v1894_v7 = vld [vmem:[%s2201_s2] ss:$0 sm:$0xff]  ;;  %s1800_s2 = smov 32  }
   0x5   :  { %1582 = vmatprep.subr.bf16.mxu0 %v1796_v0 }
   0x6   :  { %1559 = vmatmul.mubr.msk.bf16.vlgmr.msra.gmra.mrb[0].mxu0 %vm80_vm1, %v1722_v4 }
   0x7   :  { %1569 = vmatpush3.bf16.msra.mxu1 %v1874_v5  ;;  %1583 = vmatpush3.bf16.msra.mxu0 %v1860_v2 }
   0x8   :  { %1574 = vmatprep.subr.bf16.mxu1 %v1796_v0  ;;  %1584 = vmatprep.subr.bf16.mxu0 %v1796_v0 }
   0x9   :  { %1562 = vmatprep.mubr.msk.bf16.mxu0 %vm80_vm1, %v1724_v45 }
   0xa   :  { %1571 = vmatmul.mubr.bf16.vlgmr.msra.gmra.mrb[0].mxu1 %v1798_v6 }
   0xb   :  { %1575 = vmatpush3.bf16.msra.mxu1 %v1860_v2  ;;  %1578 = vmatprep.mubr.msk.bf16.mxu1 %vm1797_vm0, %v1796_v0 }
   0xc   :  { %1576 = vmatprep.subr.bf16.mxu1 %v1796_v0  ;;  %1585 = vmatpush3.bf16.msra.mxu0 %v1874_v5 }
   0xd   :  { %1598 = vmatprep.subr.bf16.mxu0 %v1796_v0 }
   0xe   :  { %1563 = vmatmul.mubr.msk.bf16.gmra.mrb[4].mxu0 %vm80_vm1, %v1725_v46 }
   0xf   :  { %1577 = vmatpush3.bf16.msra.mxu1 %v1874_v5  ;;  %1586 = vmatprep.mubr.msk.bf16.mxu0 %vm1797_vm0, %v1796_v0 }
  0x10   :  { %1590 = vmatprep.subr.bf16.mxu1 %v1796_v0 }
  0xd9   :  { %v1896_v8 = vpop.f32.mrb[0].mxu0 }
  0xda   :  { %v127_v9 = vpop.f32.mrb[1].mxu0  ;;  %v136_v56 = vadd.f32 %v1896_v8, %v1894_v7 }
  0xdb   :  { %v128_v10 = vadd.f32 %v1894_v7, %v127_v9  ;;  %v1899_v11 = vpop.f32.mrb[2].mxu0 }
  0xdc   :  { %v130_v12 = vpop.f32.mrb[3].mxu0 }
  0xdd   :  { %v208_v13 = vpop.f32.mrb[0].mxu1  ;;  %v131_v31 = vadd.f32 %v1894_v7, %v130_v12 }
  0xde   :  { %v214_v14 = vadd.f32 %v208_v13, %v128_v10  ;;  %v1572_v15 = vpop.f32.mrb[1].mxu1 }
  0xdf   :  { %v211_v16 = vpop.f32.mrb[2].mxu1 }
  0xe0   :  { %1732 = vtanh.f32 %v214_v14  ;;  %v1573_v17 = vpop.f32.mrb[3].mxu1 }
  0xe1   :  { %v1935_v51 = vpop.f32.mrb[4].mxu0  ;;  %v139_v17 = vadd.f32 %v1899_v11, %v1894_v7 }
  0xe2   :  { %v1937_v52 = vpop.f32.mrb[5].mxu0 }
  0xe3   :  { %v1939_v53 = vpop.f32.mrb[6].mxu0 }
  0xe4   :  { %v1941_v54 = vpop.f32.mrb[7].mxu0 }
  0xea   :  { %v1733_v18 = vpop.eup %1732 }
  0xeb   :  { %220 = vrot.lane.b32.xlu0 %v1733_v18, %s1799_s19  ;;  %v216_v19 = vadd.f32 1.0, %v1733_v18 }
  0xed   :  { %v217_v20 = vmul.f32 0.5, %v216_v19 }
  0xef   :  { %v218_v23 = vmul.f32 0.0, %v217_v20 }
 0x15d   :  { %v221_v21 = vpop.permute.xlu0 %220 }
 0x15e   :  { %v223_v22 = vmul.f32 %v221_v21, %v217_v20 }
 0x160   :  { %225 = vrot.lane.b32.xlu0 %v223_v22, %s1800_s2 }
 0x1d2   :  { %v226_v24 = vpop.permute.xlu0 %225 }
 0x1d3   :  { %v228_v25 = vadd.f32 %v226_v24, %v218_v23 }
 0x1d5   :  { %1734 = vtanh.f32 %v228_v25 }
 0x1df   :  { %v1735_v26 = vpop.eup %1734 }
 0x1e0   :  { %231 = vrot.lane.b32.xlu1 %v1735_v26, %s1799_s19 }
 0x252   :  { %v232_v27 = vpop.permute.xlu1 %231 }
 0x253   :  { %v1904_v28 = vmul.f32 %v232_v27, %v217_v20 }
 0x255   :  { %v235_v29 = vpack.c.bf16 %v1904_v28, %v1904_v28 }
 0x257   :  { %237 = vrot.lane.b32.xlu1 %v235_v29, %s1800_s2 }
 0x2c9   :  { %v238_v30 = vpop.permute.xlu1 %237 }
 0x2ca   :  { %1579 = vmatmul.mubr.msk.bf16.vlgmr.msra.gmra.mrb[4].mxu1 %vm170_vm2, %v238_v30 }
 0x2cb   :  { %1591 = vmatpush3.bf16.msra.mxu1 %v1860_v2  ;;  %1594 = vmatprep.mubr.msk.bf16.mxu1 %vm1797_vm0, %v1796_v0 }
 0x2cc   :  { %1592 = vmatprep.subr.bf16.mxu1 %v1796_v0 }
 0x2cf   :  { %1593 = vmatpush3.bf16.msra.mxu1 %v1874_v5 }
 0x2d0   :  { %1606 = vmatprep.subr.bf16.mxu1 %v1796_v0 }
 0x39d   :  { %v276_v32 = vpop.f32.mrb[4].mxu1 }
 0x39e   :  { %v282_v33 = vadd.f32 %v276_v32, %v131_v31  ;;  %v1580_v34 = vpop.f32.mrb[5].mxu1 }
 0x39f   :  { %v279_v35 = vpop.f32.mrb[6].mxu1 }
 0x3a0   :  { %1736 = vtanh.f32 %v282_v33  ;;  %v1581_v36 = vpop.f32.mrb[7].mxu1 }
 0x3a1   :  { %v144_v36 = vadd.f32 %v1894_v7, %v1937_v52 }
 0x3aa   :  { %v1737_v37 = vpop.eup %1736 }
 0x3ab   :  { %288 = vrot.lane.b32.xlu0 %v1737_v37, %s1799_s19  ;;  %v284_v38 = vadd.f32 1.0, %v1737_v37 }
 0x3ad   :  { %v285_v39 = vmul.f32 0.5, %v284_v38 }
 0x3af   :  { %v286_v42 = vmul.f32 %v285_v39, %v228_v25 }
 0x41d   :  { %v289_v40 = vpop.permute.xlu0 %288 }
 0x41e   :  { %v291_v41 = vmul.f32 %v289_v40, %v285_v39 }
 0x420   :  { %293 = vrot.lane.b32.xlu1 %v291_v41, %s1800_s2 }
 0x492   :  { %v294_v43 = vpop.permute.xlu1 %293 }
 0x493   :  { %v296_v44 = vadd.f32 %v294_v43, %v286_v42 }
 0x495   :  { %1738 = vtanh.f32 %v296_v44 }
 0x49f   :  { %v1739_v47 = vpop.eup %1738 }
 0x4a0   :  { %299 = vrot.lane.b32.xlu0 %v1739_v47, %s1799_s19 }
 0x512   :  { %v300_v48 = vpop.permute.xlu0 %299 }
 0x513   :  { %v1930_v49 = vmul.f32 %v300_v48, %v285_v39 }
 0x515   :  { %v303_v50 = vpack.c.bf16 %v1930_v49, %v1930_v49 }
 0x517   :  { %305 = vrot.lane.b32.xlu1 %v303_v50, %s1800_s2 }
 0x589   :  { %v306_v55 = vpop.permute.xlu1 %305 }
 0x58a   :  { %1587 = vmatmul.mubr.msk.bf16.vlgmr.msra.gmra.mrb[8].mxu0 %vm170_vm2, %v306_v55 }
 0x58b   :  { %1599 = vmatpush3.bf16.msra.mxu0 %v1860_v2  ;;  %1602 = vmatprep.mubr.msk.bf16.mxu0 %vm1797_vm0, %v1796_v0 }
 0x58c   :  { %1600 = vmatprep.subr.bf16.mxu0 %v1796_v0 }
 0x58f   :  { %1601 = vmatpush3.bf16.msra.mxu0 %v1874_v5 }
 0x590   :  { %1614 = vmatprep.subr.bf16.mxu0 %v1796_v0 }
 0x65d   :  { %v344_v57 = vpop.f32.mrb[8].mxu0 }
 0x65e   :  { %v350_v58 = vadd.f32 %v344_v57, %v136_v56  ;;  %v1588_v59 = vpop.f32.mrb[9].mxu0 }
 0x65f   :  { %v347_v60 = vpop.f32.mrb[10].mxu0  ;;  %v147_v59 = vadd.f32 %v1894_v7, %v1941_v54 }
 0x660   :  { %1740 = vtanh.f32 %v350_v58  ;;  %v1589_v61 = vpop.f32.mrb[11].mxu0 }
 0x66a   :  { %v1741_v62 = vpop.eup %1740 }
 0x66b   :  { %356 = vrot.lane.b32.xlu0 %v1741_v62, %s1799_s19  ;;  %v352_v63 = vadd.f32 1.0, %v1741_v62 }
 0x66d   :  { %v353_v1 = vmul.f32 0.5, %v352_v63 }
 0x66f   :  { %v354_v9 = vmul.f32 %v353_v1, %v296_v44 }
 0x6dd   :  { %v357_v3 = vpop.permute.xlu0 %356 }
 0x6de   :  { %v359_v4 = vmul.f32 %v357_v3, %v353_v1 }
 0x6e0   :  { %361 = vrot.lane.b32.xlu1 %v359_v4, %s1800_s2 }
 0x752   :  { %v362_v10 = vpop.permute.xlu1 %361 }
 0x753   :  { %v364_v12 = vadd.f32 %v362_v10, %v354_v9 }
 0x755   :  { %1742 = vtanh.f32 %v364_v12 }
 0x75f   :  { %v1743_v8 = vpop.eup %1742 }
 0x760   :  { %367 = vrot.lane.b32.xlu0 %v1743_v8, %s1799_s19 }
 0x7d2   :  { %v368_v13 = vpop.permute.xlu0 %367 }
 0x7d3   :  { %v1955_v14 = vmul.f32 %v368_v13, %v353_v1 }
 0x7d5   :  { %v371_v15 = vpack.c.bf16 %v1955_v14, %v1955_v14 }
 0x7d7   :  { %373 = vrot.lane.b32.xlu1 %v371_v15, %s1800_s2 }
 0x849   :  { %v374_v16 = vpop.permute.xlu1 %373 }
 0x84a   :  { %1595 = vmatmul.mubr.msk.bf16.vlgmr.msra.gmra.mrb[8].mxu1 %vm170_vm2, %v374_v16 }
 0x84b   :  { %1607 = vmatpush3.bf16.msra.mxu1 %v1860_v2  ;;  %1610 = vmatprep.mubr.msk.bf16.mxu1 %vm1797_vm0, %v1796_v0 }
 0x84c   :  { %1608 = vmatprep.subr.bf16.mxu1 %v1796_v0 }
 0x84f   :  { %1609 = vmatpush3.bf16.msra.mxu1 %v1874_v5 }
 0x850   :  { %1622 = vmatprep.subr.bf16.mxu1 %v1796_v0 }
 0x91d   :  { %v412_v18 = vpop.f32.mrb[8].mxu1 }
 0x91e   :  { %v418_v19 = vadd.f32 %v412_v18, %v139_v17  ;;  %v1596_v20 = vpop.f32.mrb[9].mxu1  ;;  %v152_v18 = vadd.f32 %v1935_v51, %v1894_v7  ;;  %v1726_v51 = vld [vmem:[%s2202_s4] sm:$0xff]  }
 0x91f   :  { %v415_v21 = vpop.f32.mrb[10].mxu1 }
 0x920   :  { %1744 = vtanh.f32 %v418_v19  ;;  %v1597_v22 = vpop.f32.mrb[11].mxu1 }
 0x92a   :  { %v1745_v23 = vpop.eup %1744 }
 0x92b   :  { %424 = vrot.lane.b32.xlu0 %v1745_v23, %s1799_s19  ;;  %v420_v24 = vadd.f32 1.0, %v1745_v23 }
 0x92d   :  { %v421_v25 = vmul.f32 0.5, %v420_v24 }
 0x92f   :  { %v422_v29 = vmul.f32 %v421_v25, %v364_v12 }
 0x99d   :  { %v425_v26 = vpop.permute.xlu0 %424 }
 0x99e   :  { %v427_v27 = vmul.f32 %v425_v26, %v421_v25 }
 0x9a0   :  { %429 = vrot.lane.b32.xlu1 %v427_v27, %s1800_s2 }
 0xa12   :  { %v430_v30 = vpop.permute.xlu1 %429 }
 0xa13   :  { %v432_v31 = vadd.f32 %v430_v30, %v422_v29 }
 0xa15   :  { %1746 = vtanh.f32 %v432_v31 }
 0xa1f   :  { %v1747_v11 = vpop.eup %1746 }
 0xa20   :  { %435 = vrot.lane.b32.xlu0 %v1747_v11, %s1799_s19 }
 0xa92   :  { %v436_v32 = vpop.permute.xlu0 %435 }
 0xa93   :  { %v1972_v33 = vmul.f32 %v436_v32, %v421_v25 }
 0xa95   :  { %v439_v34 = vpack.c.bf16 %v1972_v33, %v1972_v33 }
 0xa97   :  { %441 = vrot.lane.b32.xlu1 %v439_v34, %s1800_s2  ;;  %v711_v34 = vpack.c.bf16 %v1930_v49, %v1904_v28  ;;  %v712_v28 = vpack.c.bf16 %v1972_v33, %v1955_v14  ;;  %v2041_v49 = vld [vmem:[%s2203_s6] sm:$0xff]   ;;  %v155_v33 = vadd.f32 %v1939_v53, %v1894_v7 }
 0xb09   :  { %v442_v35 = vpop.permute.xlu1 %441 }
 0xb0a   :  { %1603 = vmatmul.mubr.msk.bf16.vlgmr.msra.gmra.mrb[12].mxu0 %vm170_vm2, %v442_v35  ;;  %v1727_v35 = vld [vmem:[%s2202_s4 + $0x8] sm:$0xff]  }
 0xb0b   :  { %1615 = vmatpush3.bf16.msra.mxu0 %v1860_v2  ;;  %1618 = vmatprep.mubr.msk.bf16.mxu0 %vm1797_vm0, %v1796_v0 }
 0xb0c   :  { %1616 = vmatprep.subr.bf16.mxu0 %v1796_v0 }
 0xb0f   :  { %1617 = vmatpush3.bf16.msra.mxu0 %v1874_v5 }
 0xb10   :  { %1630 = vmatprep.subr.bf16.mxu0 %v1726_v51 }
 0xbdd   :  { %v480_v37 = vpop.f32.mrb[12].mxu0 }
 0xbde   :  { %v486_v38 = vadd.f32 %v480_v37, %v144_v36  ;;  %v1604_v39 = vpop.f32.mrb[13].mxu0 }
 0xbdf   :  { %v483_v40 = vpop.f32.mrb[14].mxu0 }
 0xbe0   :  { %1748 = vtanh.f32 %v486_v38  ;;  %v1605_v41 = vpop.f32.mrb[15].mxu0 }
 0xbe1   :  { %v2048_v41 = vld [vmem:[%s2203_s6 + $0x8] sm:$0xff]  }
 0xbea   :  { %v1749_v42 = vpop.eup %1748 }
 0xbeb   :  { %492 = vrot.lane.b32.xlu0 %v1749_v42, %s1799_s19  ;;  %v488_v43 = vadd.f32 1.0, %v1749_v42 }
 0xbed   :  { %v489_v44 = vmul.f32 0.5, %v488_v43 }
 0xbef   :  { %v490_v47 = vmul.f32 %v489_v44, %v432_v31 }
 0xc5d   :  { %v493_v45 = vpop.permute.xlu0 %492 }
 0xc5e   :  { %v495_v46 = vmul.f32 %v493_v45, %v489_v44 }
 0xc60   :  { %497 = vrot.lane.b32.xlu1 %v495_v46, %s1800_s2  ;;  %v2072_v46 = vld [vmem:[%s2204_s5] ss:$0 sm:$0xff] }
 0xcd2   :  { %v498_v48 = vpop.permute.xlu1 %497 }
 0xcd3   :  { %v500_v50 = vadd.f32 %v498_v48, %v490_v47 }
 0xcd5   :  { %1750 = vtanh.f32 %v500_v50 }
 0xcdf   :  { %v1751_v52 = vpop.eup %1750 }
 0xce0   :  { %503 = vrot.lane.b32.xlu0 %v1751_v52, %s1799_s19 }
 0xd52   :  { %v504_v55 = vpop.permute.xlu0 %503 }
 0xd53   :  { %v1988_v56 = vmul.f32 %v504_v55, %v489_v44 }
 0xd55   :  { %v507_v57 = vpack.c.bf16 %v1988_v56, %v1988_v56 }
 0xd57   :  { %509 = vrot.lane.b32.xlu1 %v507_v57, %s1800_s2 }
 0xdc9   :  { %v510_v58 = vpop.permute.xlu1 %509 }
 0xdca   :  { %1611 = vmatmul.mubr.msk.bf16.vlgmr.msra.gmra.mrb[12].mxu1 %vm170_vm2, %v510_v58 }
 0xdcb   :  { %1623 = vmatpush3.bf16.msra.mxu1 %v1860_v2  ;;  %1626 = vmatprep.mubr.msk.bf16.mxu1 %vm1797_vm0, %v1796_v0 }
 0xdcc   :  { %1624 = vmatprep.subr.bf16.mxu1 %v1796_v0 }
 0xdcf   :  { %1625 = vmatpush3.bf16.msra.mxu1 %v1874_v5 }
 0xdd0   :  { %1642 = vmatprep.subr.bf16.mxu1 %v1796_v0 }
 0xe9d   :  { %v548_v60 = vpop.f32.mrb[12].mxu1 }
 0xe9e   :  { %v554_v61 = vadd.f32 %v548_v60, %v147_v59  ;;  %v1612_v62 = vpop.f32.mrb[13].mxu1 }
 0xe9f   :  { %v551_v63 = vpop.f32.mrb[14].mxu1 }
 0xea0   :  { %1752 = vtanh.f32 %v554_v61  ;;  %v1613_v1 = vpop.f32.mrb[15].mxu1 }
 0xeaa   :  { %v1753_v3 = vpop.eup %1752 }
 0xeab   :  { %560 = vrot.lane.b32.xlu0 %v1753_v3, %s1799_s19  ;;  %v556_v2 = vadd.f32 1.0, %v1753_v3 }
 0xead   :  { %v557_v4 = vmul.f32 0.5, %v556_v2 }
 0xeaf   :  { %v558_v5 = vmul.f32 %v557_v4, %v500_v50 }
 0xf1d   :  { %v561_v9 = vpop.permute.xlu0 %560 }
 0xf1e   :  { %v563_v10 = vmul.f32 %v561_v9, %v557_v4 }
 0xf20   :  { %565 = vrot.lane.b32.xlu1 %v563_v10, %s1800_s2 }
 0xf92   :  { %v566_v12 = vpop.permute.xlu1 %565 }
 0xf93   :  { %v568_v8 = vadd.f32 %v566_v12, %v558_v5 }
 0xf95   :  { %1754 = vtanh.f32 %v568_v8 }
 0xf9f   :  { %v1755_v54 = vpop.eup %1754 }
 0xfa0   :  { %571 = vrot.lane.b32.xlu0 %v1755_v54, %s1799_s19 }
0x1012   :  { %v572_v13 = vpop.permute.xlu0 %571 }
0x1013   :  { %v2005_v15 = vmul.f32 %v572_v13, %v557_v4 }
0x1015   :  { %v575_v16 = vpack.c.bf16 %v2005_v15, %v2005_v15 }
0x1017   :  { %577 = vrot.lane.b32.xlu1 %v575_v16, %s1800_s2 }
0x1089   :  { %v578_v17 = vpop.permute.xlu1 %577 }
0x108a   :  { %1619 = vmatmul.mubr.msk.bf16.vlgmr.msra.gmra.mrb[16].mxu0 %vm170_vm2, %v578_v17 }
0x108b   :  { %1631 = vmatpush3.bf16.msra.mxu0 %v1726_v51 }
0x108c   :  { %1632 = vmatprep.subr.bf16.mxu0 %v1727_v35 }
0x108f   :  { %1633 = vmatpush3.bf16.msra.mxu0 %v1727_v35 }
0x1090   :  { %1658 = vmatprep.subr.bf16.mxu0 %v1796_v0 }
0x115d   :  { %v616_v19 = vpop.f32.mrb[16].mxu0 }
0x115e   :  { %v622_v20 = vadd.f32 %v616_v19, %v152_v18  ;;  %v1620_v21 = vpop.f32.mrb[17].mxu0 }
0x115f   :  { %v619_v22 = vpop.f32.mrb[18].mxu0 }
0x1160   :  { %1756 = vtanh.f32 %v622_v20  ;;  %v1621_v23 = vpop.f32.mrb[19].mxu0 }
0x1161   :  { %v713_v23 = vpack.c.bf16 %v2005_v15, %v1988_v56 }
0x116a   :  { %v1757_v24 = vpop.eup %1756 }
0x116b   :  { %628 = vrot.lane.b32.xlu0 %v1757_v24, %s1799_s19  ;;  %v624_v25 = vadd.f32 1.0, %v1757_v24 }
0x116d   :  { %v625_v26 = vmul.f32 0.5, %v624_v25 }
0x116f   :  { %v626_v30 = vmul.f32 %v625_v26, %v568_v8 }
0x11dd   :  { %v629_v27 = vpop.permute.xlu0 %628 }
0x11de   :  { %v631_v29 = vmul.f32 %v629_v27, %v625_v26 }
0x11e0   :  { %633 = vrot.lane.b32.xlu1 %v631_v29, %s1800_s2 }
0x1252   :  { %v634_v31 = vpop.permute.xlu1 %633 }
0x1253   :  { %v2015_v11 = vadd.f32 %v634_v31, %v626_v30 }
0x1255   :  { %1758 = vtanh.f32 %v2015_v11 }
0x125f   :  { %v1759_v32 = vpop.eup %1758 }
0x1260   :  { %639 = vrot.lane.b32.xlu0 %v1759_v32, %s1799_s19 }
0x1264   :  { %734 = vrot.lane.b32.xlu0 %v711_v34, %s1800_s2 }
0x12d2   :  { %v640_v36 = vpop.permute.xlu0 %639 }
0x12d3   :  { %v2029_v37 = vmul.f32 %v640_v36, %v625_v26 }
0x12d5   :  { %v643_v38 = vpack.c.bf16 %v2029_v37, %v2029_v37 }
0x12d6   :  { %v735_v39 = vpop.permute.xlu0 %734 }
0x12d7   :  { %645 = vrot.lane.b32.xlu1 %v643_v38, %s1800_s2  ;;  %1634 = vmatprep.mubr.msk.bf16.mxu0 %vm170_vm2, %v735_v39 }
0x12db   :  { %736 = vrot.lane.b32.xlu1 %v712_v28, %s1800_s2 }
0x1349   :  { %v646_v40 = vpop.permute.xlu1 %645 }
0x134a   :  { %1627 = vmatmul.mubr.msk.bf16.vlgmr.msra.gmra.mrb[16].mxu1 %vm170_vm2, %v646_v40 }
0x134b   :  { %1643 = vmatpush3.bf16.msra.mxu1 %v2041_v49  ;;  %1646 = vmatprep.mubr.msk.bf16.mxu1 %vm1797_vm0, %v1796_v0 }
0x134c   :  { %1644 = vmatprep.subr.bf16.mxu1 %v1796_v0 }
0x134d   :  { %v737_v14 = vpop.permute.xlu1 %736 }
0x134e   :  { %1635 = vmatmul.mubr.msk.bf16.vlgmr.msra.gmra.mrb[20].mxu0 %vm170_vm2, %v737_v14 }
0x134f   :  { %1645 = vmatpush3.bf16.msra.mxu1 %v2048_v41  ;;  %1659 = vmatpush3.bf16.msra.mxu0 %v2041_v49 }
0x1350   :  { %1650 = vmatprep.subr.bf16.mxu1 %v1796_v0  ;;  %1660 = vmatprep.subr.bf16.mxu0 %v1796_v0 }
0x1352   :  { %1647 = vmatmul.mubr.bf16.vlgmr.msra.gmra.mrb[20].mxu1 %v1798_v6 }
0x1353   :  { %1651 = vmatpush3.bf16.msra.mxu1 %v2041_v49  ;;  %1654 = vmatprep.mubr.msk.bf16.mxu1 %vm1797_vm0, %v1796_v0 }
0x1354   :  { %1652 = vmatprep.subr.bf16.mxu1 %v1796_v0  ;;  %1661 = vmatpush3.bf16.msra.mxu0 %v2048_v41 }
0x1355   :  { %1674 = vmatprep.subr.bf16.mxu0 %v1796_v0 }
0x1357   :  { %1653 = vmatpush3.bf16.msra.mxu1 %v2048_v41 }
0x1358   :  { %1666 = vmatprep.subr.bf16.mxu1 %v1796_v0 }
0x141d   :  { %v684_v42 = vpop.f32.mrb[16].mxu1 }
0x141e   :  { %v690_v6 = vadd.f32 %v684_v42, %v155_v33  ;;  %v1628_v43 = vpop.f32.mrb[17].mxu1 }
0x141f   :  { %v687_v44 = vpop.f32.mrb[18].mxu1 }
0x1420   :  { %v1629_v45 = vpop.f32.mrb[19].mxu1 }
0x1421   :  { %v2074_v47 = vpop.f32.mrb[20].mxu0 }
0x1422   :  { %v800_v48 = vpop.f32.mrb[21].mxu0 }
0x1423   :  { %v801_v50 = vadd.f32 %v2072_v46, %v800_v48  ;;  %v2077_v52 = vpop.f32.mrb[22].mxu0 }
0x1424   :  { %v803_v55 = vpop.f32.mrb[23].mxu0 }
0x1425   :  { %v877_v57 = vpop.f32.mrb[20].mxu1  ;;  %v804_v26 = vadd.f32 %v2072_v46, %v803_v55 }
0x1426   :  { %v883_v7 = vadd.f32 %v877_v57, %v801_v50  ;;  %v1648_v53 = vpop.f32.mrb[21].mxu1  ;;  %v809_v50 = vadd.f32 %v2074_v47, %v2072_v46 }
0x1427   :  { %v880_v58 = vpop.f32.mrb[22].mxu1 }
0x1428   :  { %1760 = vtanh.f32 %v883_v7  ;;  %v1649_v59 = vpop.f32.mrb[23].mxu1 }
0x1432   :  { %v1761_v60 = vpop.eup %1760 }
0x1433   :  { %889 = vrot.lane.b32.xlu0 %v1761_v60, %s1799_s19  ;;  %v885_v61 = vadd.f32 1.0, %v1761_v60 }
0x1435   :  { %v886_v62 = vmul.f32 0.5, %v885_v61 }
0x1437   :  { %v887_v3 = vmul.f32 0.0, %v886_v62 }
0x14a5   :  { %v890_v63 = vpop.permute.xlu0 %889 }
0x14a6   :  { %v892_v1 = vmul.f32 %v890_v63, %v886_v62 }
0x14a8   :  { %894 = vrot.lane.b32.xlu1 %v892_v1, %s1800_s2 }
0x151a   :  { %v895_v2 = vpop.permute.xlu1 %894 }
0x151b   :  { %v897_v4 = vadd.f32 %v895_v2, %v887_v3 }
0x151d   :  { %1762 = vtanh.f32 %v897_v4 }
0x151e   :  { %1764 = vtanh.f32 %v690_v6 }
0x1527   :  { %v1763_v9 = vpop.eup %1762 }
0x1528   :  { %900 = vrot.lane.b32.xlu0 %v1763_v9, %s1799_s19  ;;  %v1765_v10 = vpop.eup %1764 }
0x1529   :  { %v692_v5 = vadd.f32 1.0, %v1765_v10 }
0x152b   :  { %v693_v13 = vmul.f32 0.5, %v692_v5 }
0x152c   :  { %696 = vrot.lane.b32.xlu0 %v1765_v10, %s1799_s19 }
0x152d   :  { %v694_v19 = vmul.f32 %v693_v13, %v2015_v11 }
0x159a   :  { %v901_v12 = vpop.permute.xlu0 %900 }
0x159b   :  { %v903_v8 = vmul.f32 %v901_v12, %v886_v62  ;;  %v812_v12 = vadd.f32 %v2077_v52, %v2072_v46 }
0x159d   :  { %v904_v54 = vpack.c.bf16 %v903_v8, %v903_v8 }
0x159e   :  { %v697_v16 = vpop.permute.xlu0 %696 }
0x159f   :  { %v699_v17 = vmul.f32 %v697_v16, %v693_v13  ;;  %906 = vrot.lane.b32.xlu1 %v904_v54, %s1800_s2 }
0x15a1   :  { %701 = vrot.lane.b32.xlu0 %v699_v17, %s1800_s2 }
0x1611   :  { %v907_v18 = vpop.permute.xlu1 %906 }
0x1612   :  { %1655 = vmatmul.mubr.msk.bf16.vlgmr.msra.gmra.mrb[24].mxu1 %vm170_vm2, %v907_v18 }
0x1613   :  { %v702_v20 = vpop.permute.xlu0 %701  ;;  %1667 = vmatpush3.bf16.msra.mxu1 %v2041_v49  ;;  %1670 = vmatprep.mubr.msk.bf16.mxu1 %vm1797_vm0, %v1796_v0 }
0x1614   :  { %v704_v21 = vadd.f32 %v702_v20, %v694_v19  ;;  %1668 = vmatprep.subr.bf16.mxu1 %v1796_v0 }
0x1616   :  { %1766 = vtanh.f32 %v704_v21 }
0x1617   :  { %1669 = vmatpush3.bf16.msra.mxu1 %v2048_v41 }
0x1618   :  { %1682 = vmatprep.subr.bf16.mxu1 %v1796_v0 }
0x1620   :  { %v1767_v22 = vpop.eup %1766 }
0x1621   :  { %707 = vrot.lane.b32.xlu0 %v1767_v22, %s1799_s19 }
0x1625   :  { %738 = vrot.lane.b32.xlu0 %v713_v23, %s1800_s2 }
0x1693   :  { %v708_v24 = vpop.permute.xlu0 %707 }
0x1694   :  { %v710_v39 = vmul.f32 %v708_v24, %v693_v13 }
0x1696   :  { %v714_v40 = vpack.c.bf16 %v710_v39, %v2029_v37 }
0x1697   :  { %v739_v25 = vpop.permute.xlu0 %738 }
0x1698   :  { %1638 = vmatprep.mubr.msk.bf16.mxu0 %vm170_vm2, %v739_v25 }
0x16e5   :  { %v945_v27 = vpop.f32.mrb[24].mxu1 }
0x16e6   :  { %v951_v29 = vadd.f32 %v945_v27, %v804_v26  ;;  %v1656_v30 = vpop.f32.mrb[25].mxu1 }
0x16e7   :  { %v948_v31 = vpop.f32.mrb[26].mxu1 }
0x16e8   :  { %1768 = vtanh.f32 %v951_v29  ;;  %v1657_v11 = vpop.f32.mrb[27].mxu1 }
0x16f2   :  { %v1769_v51 = vpop.eup %1768 }
0x16f3   :  { %957 = vrot.lane.b32.xlu1 %v1769_v51, %s1799_s19  ;;  %v953_v32 = vadd.f32 1.0, %v1769_v51 }
0x16f5   :  { %v954_v34 = vmul.f32 0.5, %v953_v32 }
0x16f7   :  { %v955_v35 = vmul.f32 %v954_v34, %v897_v4 }
0x1765   :  { %v958_v56 = vpop.permute.xlu1 %957 }
0x1766   :  { %v960_v15 = vmul.f32 %v958_v56, %v954_v34 }
0x1768   :  { %962 = vrot.lane.b32.xlu1 %v960_v15, %s1800_s2 }
0x17da   :  { %v963_v36 = vpop.permute.xlu1 %962 }
0x17db   :  { %v965_v38 = vadd.f32 %v963_v36, %v955_v35 }
0x17dd   :  { %1770 = vtanh.f32 %v965_v38 }
0x17e7   :  { %v1771_v28 = vpop.eup %1770 }
0x17e8   :  { %968 = vrot.lane.b32.xlu1 %v1771_v28, %s1799_s19 }
0x17ec   :  { %740 = vrot.lane.b32.xlu1 %v714_v40, %s1800_s2 }
0x185a   :  { %v969_v14 = vpop.permute.xlu1 %968 }
0x185b   :  { %v971_v33 = vmul.f32 %v969_v14, %v954_v34 }
0x185d   :  { %v972_v42 = vpack.c.bf16 %v971_v33, %v971_v33 }
0x185e   :  { %v741_v6 = vpop.permute.xlu1 %740 }
0x185f   :  { %974 = vrot.lane.b32.xlu0 %v972_v42, %s1800_s2  ;;  %1639 = vmatmul.mubr.msk.bf16.gmra.mrb[24].mxu0 %vm170_vm2, %v741_v6 }
0x1860   :  { %1662 = vmatprep.mubr.msk.bf16.mxu0 %vm1797_vm0, %v1796_v0 }
0x18d1   :  { %v975_v43 = vpop.permute.xlu0 %974 }
0x18d2   :  { %1663 = vmatmul.mubr.msk.bf16.vlgmr.msra.gmra.mrb[28].mxu0 %vm170_vm2, %v975_v43 }
0x18d3   :  { %1675 = vmatpush3.bf16.msra.mxu0 %v2041_v49  ;;  %1678 = vmatprep.mubr.msk.bf16.mxu0 %vm1797_vm0, %v1796_v0 }
0x18d4   :  { %1676 = vmatprep.subr.bf16.mxu0 %v1796_v0 }
0x18d7   :  { %1677 = vmatpush3.bf16.msra.mxu0 %v2048_v41 }
0x18d8   :  { %1690 = vmatprep.subr.bf16.mxu0 %v1796_v0 }
0x1932   :  { %v2115_v37 = vpop.f32.mrb[24].mxu0 }
0x1933   :  { %v2117_v44 = vpop.f32.mrb[25].mxu0 }
0x1934   :  { %v2119_v45 = vpop.f32.mrb[26].mxu0  ;;  %v817_v31 = vadd.f32 %v2072_v46, %v2117_v44 }
0x1935   :  { %v2121_v48 = vpop.f32.mrb[27].mxu0 }
0x19a5   :  { %v1013_v55 = vpop.f32.mrb[28].mxu0 }
0x19a6   :  { %v1019_v57 = vadd.f32 %v1013_v55, %v809_v50  ;;  %v1664_v7 = vpop.f32.mrb[29].mxu0  ;;  %v820_v50 = vadd.f32 %v2072_v46, %v2121_v48 }
0x19a7   :  { %v1016_v53 = vpop.f32.mrb[30].mxu0 }
0x19a8   :  { %1772 = vtanh.f32 %v1019_v57  ;;  %v1665_v58 = vpop.f32.mrb[31].mxu0 }
0x19b2   :  { %v1773_v59 = vpop.eup %1772 }
0x19b3   :  { %1025 = vrot.lane.b32.xlu1 %v1773_v59, %s1799_s19  ;;  %v1021_v60 = vadd.f32 1.0, %v1773_v59 }
0x19b5   :  { %v1022_v61 = vmul.f32 0.5, %v1021_v60 }
0x19b7   :  { %v1023_v1 = vmul.f32 %v1022_v61, %v965_v38 }
0x1a25   :  { %v1026_v62 = vpop.permute.xlu1 %1025 }
0x1a26   :  { %v1028_v63 = vmul.f32 %v1026_v62, %v1022_v61 }
0x1a28   :  { %1030 = vrot.lane.b32.xlu0 %v1028_v63, %s1800_s2 }
0x1a9a   :  { %v1031_v3 = vpop.permute.xlu0 %1030 }
0x1a9b   :  { %v1033_v2 = vadd.f32 %v1031_v3, %v1023_v1 }
0x1a9d   :  { %1774 = vtanh.f32 %v1033_v2 }
0x1aa7   :  { %v1775_v47 = vpop.eup %1774 }
0x1aa8   :  { %1036 = vrot.lane.b32.xlu1 %v1775_v47, %s1799_s19 }
0x1b1a   :  { %v1037_v4 = vpop.permute.xlu1 %1036 }
0x1b1b   :  { %v1039_v9 = vmul.f32 %v1037_v4, %v1022_v61 }
0x1b1d   :  { %v1040_v10 = vpack.c.bf16 %v1039_v9, %v1039_v9  ;;  %v825_v9 = vadd.f32 %v2115_v37, %v2072_v46 }
0x1b1f   :  { %1042 = vrot.lane.b32.xlu0 %v1040_v10, %s1800_s2 }
0x1b91   :  { %v1043_v5 = vpop.permute.xlu0 %1042 }
0x1b92   :  { %1671 = vmatmul.mubr.msk.bf16.vlgmr.msra.gmra.mrb[28].mxu1 %vm170_vm2, %v1043_v5 }
0x1b93   :  { %1683 = vmatpush3.bf16.msra.mxu1 %v2041_v49  ;;  %1686 = vmatprep.mubr.msk.bf16.mxu1 %vm1797_vm0, %v1796_v0 }
0x1b94   :  { %1684 = vmatprep.subr.bf16.mxu1 %v1796_v0 }
0x1b97   :  { %1685 = vmatpush3.bf16.msra.mxu1 %v2048_v41 }
0x1b98   :  { %1698 = vmatprep.subr.bf16.mxu1 %v1796_v0 }
0x1c65   :  { %v1081_v8 = vpop.f32.mrb[28].mxu1 }
0x1c66   :  { %v1087_v54 = vadd.f32 %v1081_v8, %v812_v12  ;;  %v1672_v13 = vpop.f32.mrb[29].mxu1 }
0x1c67   :  { %v1084_v16 = vpop.f32.mrb[30].mxu1 }
0x1c68   :  { %1776 = vtanh.f32 %v1087_v54  ;;  %v1673_v17 = vpop.f32.mrb[31].mxu1 }
0x1c72   :  { %v1777_v18 = vpop.eup %1776 }
0x1c73   :  { %1093 = vrot.lane.b32.xlu1 %v1777_v18, %s1799_s19  ;;  %v1089_v19 = vadd.f32 1.0, %v1777_v18 }
0x1c75   :  { %v1090_v20 = vmul.f32 0.5, %v1089_v19 }
0x1c77   :  { %v1091_v23 = vmul.f32 %v1090_v20, %v1033_v2 }
0x1ce5   :  { %v1094_v21 = vpop.permute.xlu1 %1093 }
0x1ce6   :  { %v1096_v22 = vmul.f32 %v1094_v21, %v1090_v20 }
0x1ce8   :  { %1098 = vrot.lane.b32.xlu0 %v1096_v22, %s1800_s2 }
0x1d5a   :  { %v1099_v24 = vpop.permute.xlu0 %1098 }
0x1d5b   :  { %v1101_v25 = vadd.f32 %v1099_v24, %v1091_v23 }
0x1d5d   :  { %1778 = vtanh.f32 %v1101_v25 }
0x1d67   :  { %v1779_v52 = vpop.eup %1778 }
0x1d68   :  { %1104 = vrot.lane.b32.xlu1 %v1779_v52, %s1799_s19 }
0x1dda   :  { %v1105_v26 = vpop.permute.xlu1 %1104 }
0x1ddb   :  { %v1107_v27 = vmul.f32 %v1105_v26, %v1090_v20  ;;  %v828_v26 = vadd.f32 %v2119_v45, %v2072_v46  ;;  %v1730_v46 = vld [vmem:[%s2205_s7] sm:$0xff]   ;;  %v1731_v45 = vld [vmem:[%s2205_s7 + $0x8] sm:$0xff]  }
0x1ddd   :  { %v1108_v29 = vpack.c.bf16 %v1107_v27, %v1107_v27 }
0x1ddf   :  { %1110 = vrot.lane.b32.xlu0 %v1108_v29, %s1800_s2 }
0x1e51   :  { %v1111_v30 = vpop.permute.xlu0 %1110 }
0x1e52   :  { %1679 = vmatmul.mubr.msk.bf16.vlgmr.msra.gmra.mrb[32].mxu0 %vm170_vm2, %v1111_v30 }
0x1e53   :  { %1691 = vmatpush3.bf16.msra.mxu0 %v2041_v49  ;;  %1694 = vmatprep.mubr.msk.bf16.mxu0 %vm1797_vm0, %v1796_v0 }
0x1e54   :  { %1692 = vmatprep.subr.bf16.mxu0 %v1796_v0 }
0x1e57   :  { %1693 = vmatpush3.bf16.msra.mxu0 %v2048_v41 }
0x1e58   :  { %1706 = vmatprep.subr.bf16.mxu0 %v1796_v0 }
0x1f25   :  { %v1149_v11 = vpop.f32.mrb[32].mxu0 }
0x1f26   :  { %v1155_v51 = vadd.f32 %v1149_v11, %v817_v31  ;;  %v1680_v32 = vpop.f32.mrb[33].mxu0 }
0x1f27   :  { %v1152_v34 = vpop.f32.mrb[34].mxu0 }
0x1f28   :  { %1780 = vtanh.f32 %v1155_v51  ;;  %v1681_v56 = vpop.f32.mrb[35].mxu0 }
0x1f32   :  { %v1781_v15 = vpop.eup %1780 }
0x1f33   :  { %1161 = vrot.lane.b32.xlu1 %v1781_v15, %s1799_s19  ;;  %v1157_v35 = vadd.f32 1.0, %v1781_v15 }
0x1f35   :  { %v1158_v36 = vmul.f32 0.5, %v1157_v35 }
0x1f37   :  { %v1159_v28 = vmul.f32 %v1158_v36, %v1101_v25 }
0x1fa5   :  { %v1162_v38 = vpop.permute.xlu1 %1161 }
0x1fa6   :  { %v1164_v39 = vmul.f32 %v1162_v38, %v1158_v36 }
0x1fa8   :  { %1166 = vrot.lane.b32.xlu0 %v1164_v39, %s1800_s2 }
0x201a   :  { %v1167_v40 = vpop.permute.xlu0 %1166 }
0x201b   :  { %v1169_v14 = vadd.f32 %v1167_v40, %v1159_v28 }
0x201d   :  { %1782 = vtanh.f32 %v1169_v14 }
0x2027   :  { %v1783_v33 = vpop.eup %1782 }
0x2028   :  { %1172 = vrot.lane.b32.xlu1 %v1783_v33, %s1799_s19 }
0x209a   :  { %v1173_v42 = vpop.permute.xlu1 %1172 }
0x209b   :  { %v1175_v6 = vmul.f32 %v1173_v42, %v1158_v36  ;;  %v1490_v42 = vld [vmem:[%s2206_s8] ss:$0 sm:$0xff] }
0x209d   :  { %v1176_v43 = vpack.c.bf16 %v1175_v6, %v1175_v6 }
0x209f   :  { %1178 = vrot.lane.b32.xlu0 %v1176_v43, %s1800_s2 }
0x2111   :  { %v1179_v44 = vpop.permute.xlu0 %1178 }
0x2112   :  { %1687 = vmatmul.mubr.msk.bf16.vlgmr.msra.gmra.mrb[32].mxu1 %vm170_vm2, %v1179_v44 }
0x2113   :  { %1699 = vmatpush3.bf16.msra.mxu1 %v2041_v49  ;;  %1702 = vmatprep.mubr.msk.bf16.mxu1 %vm1797_vm0, %v1796_v0 }
0x2114   :  { %1700 = vmatprep.subr.bf16.mxu1 %v1796_v0 }
0x2117   :  { %1701 = vmatpush3.bf16.msra.mxu1 %v2048_v41 }
0x21e5   :  { %v1217_v55 = vpop.f32.mrb[32].mxu1 }
0x21e6   :  { %v1223_v57 = vadd.f32 %v1217_v55, %v820_v50  ;;  %v1688_v7 = vpop.f32.mrb[33].mxu1 }
0x21e7   :  { %v1220_v53 = vpop.f32.mrb[34].mxu1 }
0x21e8   :  { %1784 = vtanh.f32 %v1223_v57  ;;  %v1689_v58 = vpop.f32.mrb[35].mxu1 }
0x21f2   :  { %v1785_v59 = vpop.eup %1784 }
0x21f3   :  { %1229 = vrot.lane.b32.xlu1 %v1785_v59, %s1799_s19  ;;  %v1225_v49 = vadd.f32 1.0, %v1785_v59 }
0x21f5   :  { %v1226_v60 = vmul.f32 0.5, %v1225_v49 }
0x21f7   :  { %v1227_v63 = vmul.f32 %v1226_v60, %v1169_v14 }
0x2265   :  { %v1230_v61 = vpop.permute.xlu1 %1229 }
0x2266   :  { %v1232_v62 = vmul.f32 %v1230_v61, %v1226_v60 }
0x2268   :  { %1234 = vrot.lane.b32.xlu0 %v1232_v62, %s1800_s2 }
0x22da   :  { %v1235_v41 = vpop.permute.xlu0 %1234 }
0x22db   :  { %v1237_v1 = vadd.f32 %v1235_v41, %v1227_v63 }
0x22dd   :  { %1786 = vtanh.f32 %v1237_v1 }
0x22e7   :  { %v1787_v48 = vpop.eup %1786 }
0x22e8   :  { %1240 = vrot.lane.b32.xlu1 %v1787_v48, %s1799_s19 }
0x235a   :  { %v1241_v3 = vpop.permute.xlu1 %1240 }
0x235b   :  { %v1243_v2 = vmul.f32 %v1241_v3, %v1226_v60 }
0x235d   :  { %v1244_v47 = vpack.c.bf16 %v1243_v2, %v1243_v2 }
0x235f   :  { %1246 = vrot.lane.b32.xlu0 %v1244_v47, %s1800_s2 }
0x23d1   :  { %v1247_v4 = vpop.permute.xlu0 %1246 }
0x23d2   :  { %1695 = vmatmul.mubr.msk.bf16.vlgmr.msra.gmra.mrb[36].mxu0 %vm170_vm2, %v1247_v4 }
0x23d3   :  { %1710 = vmatprep.mubr.msk.bf16.mxu0 %vm1797_vm0, %v1796_v0  ;;  %1707 = vmatpush3.bf16.msra.mxu0 %v1730_v46 }
0x23d4   :  { %1708 = vmatprep.subr.bf16.mxu0 %v1796_v0 }
0x23d7   :  { %1709 = vmatpush3.bf16.msra.mxu0 %v1731_v45 }
0x24a5   :  { %v1285_v10 = vpop.f32.mrb[36].mxu0 }
0x24a6   :  { %v1291_v5 = vadd.f32 %v1285_v10, %v825_v9  ;;  %v1696_v12 = vpop.f32.mrb[37].mxu0 }
0x24a7   :  { %v1288_v8 = vpop.f32.mrb[38].mxu0 }
0x24a8   :  { %1788 = vtanh.f32 %v1291_v5  ;;  %v1697_v54 = vpop.f32.mrb[39].mxu0 }
0x24b2   :  { %v1789_v13 = vpop.eup %1788 }
0x24b3   :  { %1297 = vrot.lane.b32.xlu1 %v1789_v13, %s1799_s19  ;;  %v1293_v16 = vadd.f32 1.0, %v1789_v13 }
0x24b5   :  { %v1294_v17 = vmul.f32 0.5, %v1293_v16 }
0x24b7   :  { %v1295_v20 = vmul.f32 %v1294_v17, %v1237_v1 }
0x2525   :  { %v1298_v18 = vpop.permute.xlu1 %1297 }
0x2526   :  { %v1300_v19 = vmul.f32 %v1298_v18, %v1294_v17 }
0x2528   :  { %1302 = vrot.lane.b32.xlu0 %v1300_v19, %s1800_s2 }
0x259a   :  { %v1303_v21 = vpop.permute.xlu0 %1302 }
0x259b   :  { %v1305_v22 = vadd.f32 %v1303_v21, %v1295_v20 }
0x259d   :  { %1790 = vtanh.f32 %v1305_v22 }
0x25a7   :  { %v1791_v37 = vpop.eup %1790 }
0x25a8   :  { %1308 = vrot.lane.b32.xlu1 %v1791_v37, %s1799_s19 }
0x261a   :  { %v1309_v23 = vpop.permute.xlu1 %1308 }
0x261b   :  { %v1311_v24 = vmul.f32 %v1309_v23, %v1294_v17 }
0x261d   :  { %v1312_v25 = vpack.c.bf16 %v1311_v24, %v1311_v24 }
0x261f   :  { %1314 = vrot.lane.b32.xlu0 %v1312_v25, %s1800_s2 }
0x2691   :  { %v1315_v52 = vpop.permute.xlu0 %1314 }
0x2692   :  { %1703 = vmatmul.mubr.msk.bf16.vlgmr.msra.gmra.mrb[36].mxu1 %vm170_vm2, %v1315_v52 }
0x2765   :  { %v1353_v27 = vpop.f32.mrb[36].mxu1 }
0x2766   :  { %v1359_v29 = vadd.f32 %v1353_v27, %v828_v26  ;;  %v1704_v30 = vpop.f32.mrb[37].mxu1 }
0x2767   :  { %v1356_v31 = vpop.f32.mrb[38].mxu1 }
0x2768   :  { %1792 = vtanh.f32 %v1359_v29  ;;  %v1705_v11 = vpop.f32.mrb[39].mxu1 }
0x2772   :  { %v1793_v51 = vpop.eup %1792 }
0x2773   :  { %1365 = vrot.lane.b32.xlu1 %v1793_v51, %s1799_s19  ;;  %v1361_v32 = vadd.f32 1.0, %v1793_v51 }
0x2775   :  { %v1362_v34 = vmul.f32 0.5, %v1361_v32 }
0x2777   :  { %v1363_v35 = vmul.f32 %v1362_v34, %v1305_v22 }
0x27e5   :  { %v1366_v56 = vpop.permute.xlu1 %1365 }
0x27e6   :  { %v1368_v15 = vmul.f32 %v1366_v56, %v1362_v34 }
0x27e8   :  { %1370 = vrot.lane.b32.xlu0 %v1368_v15, %s1800_s2 }
0x285a   :  { %v1371_v36 = vpop.permute.xlu0 %1370 }
0x285b   :  { %v1373_v38 = vadd.f32 %v1371_v36, %v1363_v35 }
0x285d   :  { %1794 = vtanh.f32 %v1373_v38 }
0x2867   :  { %v1795_v39 = vpop.eup %1794 }
0x2868   :  { %1376 = vrot.lane.b32.xlu1 %v1795_v39, %s1799_s19 }
0x28da   :  { %v1377_v28 = vpop.permute.xlu1 %1376 }
0x28db   :  { %v1379_v40 = vmul.f32 %v1377_v28, %v1362_v34 }
0x28dd   :  { %v1380_v14 = vpack.c.bf16 %v1379_v40, %v1379_v40 }
0x28df   :  { %1393 = vrot.lane.b32.xlu0 %v1380_v14, %s1800_s2 }
0x2951   :  { %v1394_v33 = vpop.permute.xlu0 %1393 }
0x2952   :  { %1711 = vmatmul.mubr.msk.bf16.vlgmr.msra.gmra.mrb[40].mxu0 %vm170_vm2, %v1394_v33 }
0x2a25   :  { %v1444_v6 = vpop.f32.mrb[40].mxu0 }
0x2a26   :  { %v1445_v43 = vadd.f32 %v1490_v42, %v1444_v6  ;;  %v1712_v44 = vpop.f32.mrb[41].mxu0 }
0x2a27   :  { %v1447_v0 = vpop.f32.mrb[42].mxu0 }
0x2a28   :  { %1450 = vst.msk [vmem:[%s2207_s9] sm:$0xff] %vm80_vm1, %v1445_v43  ;;  %v1713_v50 = vpop.f32.mrb[43].mxu0 }

</bundles_post_ra>
